<compile_context>
chip_gen: v7x
topology: tpu7x:2x2x1
jax: 0.10.0
libtpu: 0.0.40
codegen_flags: <defaults>
</compile_context>

<pallas_src>
import functools

import numpy as np
import jax
import jax.numpy as jnp
from jax import lax
from jax.experimental import pallas as pl
from jax.experimental.pallas import tpu as pltpu


# ----------------------------------------------------------------------------
# Pallas kernels
# ----------------------------------------------------------------------------

def _gemm_bn_kernel(x_ref, w_ref, scale_ref, bias_ref, out_ref, *, relu):
    """out = act(patches @ w * scale + bias) for one (batch, Cout-tile) block."""
    y = jnp.dot(x_ref[0], w_ref[...], preferred_element_type=jnp.float32)
    y = y * scale_ref[...] + bias_ref[...]
    if relu:
        y = jnp.maximum(y, 0.0)
    out_ref[0] = y.astype(out_ref.dtype)


def _gemm_bn_res_kernel(x_ref, w_ref, scale_ref, bias_ref, res_ref, out_ref, *, relu):
    """Same as above with a fused residual add before the activation."""
    y = jnp.dot(x_ref[0], w_ref[...], preferred_element_type=jnp.float32)
    y = y * scale_ref[...] + bias_ref[...] + res_ref[0]
    if relu:
        y = jnp.maximum(y, 0.0)
    out_ref[0] = y.astype(out_ref.dtype)


def _maxpool_kernel(x_ref, out_ref):
    # x_ref: (1, taps, Ho*Wo, C) -> elementwise max over the taps axis (VPU only).
    out_ref[0] = jnp.max(x_ref[0], axis=0)


# ----------------------------------------------------------------------------
# Wrappers (layout plumbing in XLA, compute in Pallas)
# ----------------------------------------------------------------------------

def _im2col(x, kh, kw, stride, padding):
    """x: (N,H,W,C) -> (N, Ho*Wo, KH*KW*C), plus Ho, Wo.  Zero padding."""
    n, h, w, c = x.shape
    ho = (h + 2 * padding - kh) // stride + 1
    wo = (w + 2 * padding - kw) // stride + 1
    xp = jnp.pad(x, ((0, 0), (padding, padding), (padding, padding), (0, 0)))
    cols = []
    for i in range(kh):
        for j in range(kw):
            cols.append(lax.slice(
                xp, (0, i, j, 0),
                (n, i + stride * (ho - 1) + 1, j + stride * (wo - 1) + 1, c),
                (1, stride, stride, 1)))
    patches = jnp.stack(cols, axis=3)               # (N, Ho, Wo, KH*KW, C)
    return patches.reshape(n, ho * wo, kh * kw * c), ho, wo


def conv_bn(x, w_hwio, scale, bias, *, stride, padding, relu=True, residual=None):
    """Fused conv + (folded) BN + optional residual + optional ReLU.  NHWC in/out."""
    n, _, _, cin = x.shape
    kh, kw, _, cout = w_hwio.shape
    patches, ho, wo = _im2col(x.astype(jnp.float32), kh, kw, stride, padding)
    m = ho * wo
    kc = kh * kw * cin
    w2 = w_hwio.reshape(kc, cout).astype(jnp.float32)
    scale2 = scale.reshape(1, cout).astype(jnp.float32)
    bias2 = bias.reshape(1, cout).astype(jnp.float32)

    ct = min(cout, 128)                 # Cout tile bounds the resident weight block
    nj = cout // ct

    in_specs = [
        pl.BlockSpec((1, m, kc), lambda b, j: (b, 0, 0)),
        pl.BlockSpec((kc, ct), lambda b, j: (0, j)),
        pl.BlockSpec((1, ct), lambda b, j: (0, j)),
        pl.BlockSpec((1, ct), lambda b, j: (0, j)),
    ]
    args = [patches, w2, scale2, bias2]
    if residual is not None:
        in_specs.append(pl.BlockSpec((1, m, ct), lambda b, j: (b, 0, j)))
        args.append(residual.reshape(n, m, cout).astype(jnp.float32))
        kernel = functools.partial(_gemm_bn_res_kernel, relu=relu)
    else:
        kernel = functools.partial(_gemm_bn_kernel, relu=relu)

    out = pl.pallas_call(
        kernel,
        out_shape=jax.ShapeDtypeStruct((n, m, cout), jnp.float32),
        grid=(n, nj),
        in_specs=in_specs,
        out_specs=pl.BlockSpec((1, m, ct), lambda b, j: (b, 0, j)),
        compiler_params=pltpu.CompilerParams(
            dimension_semantics=("parallel", "parallel")),
    )(*args)
    return out.reshape(n, ho, wo, cout)


def maxpool2d(x, *, kernel=3, stride=2, padding=1):
    n, h, w, c = x.shape
    ho = (h + 2 * padding - kernel) // stride + 1
    wo = (w + 2 * padding - kernel) // stride + 1
    xp = jnp.pad(x, ((0, 0), (padding, padding), (padding, padding), (0, 0)),
                 constant_values=-1e30)
    taps = []
    for i in range(kernel):
        for j in range(kernel):
            taps.append(lax.slice(
                xp, (0, i, j, 0),
                (n, i + stride * (ho - 1) + 1, j + stride * (wo - 1) + 1, c),
                (1, stride, stride, 1)))
    t = jnp.stack(taps, axis=1).reshape(n, kernel * kernel, ho * wo, c)

    out = pl.pallas_call(
        _maxpool_kernel,
        out_shape=jax.ShapeDtypeStruct((n, ho * wo, c), jnp.float32),
        grid=(n,),
        in_specs=[pl.BlockSpec((1, kernel * kernel, ho * wo, c),
                               lambda b: (b, 0, 0, 0))],
        out_specs=pl.BlockSpec((1, ho * wo, c), lambda b: (b, 0, 0)),
        compiler_params=pltpu.CompilerParams(dimension_semantics=("parallel",)),
    )(t)
    return out.reshape(n, ho, wo, c)


# ----------------------------------------------------------------------------
# ResNet-18 backbone (BasicBlock) parameters + forward
# ----------------------------------------------------------------------------

def _bn_fold(gamma, beta, mean, var, eps=1e-5):
    scale = gamma / jnp.sqrt(var + eps)
    return scale, beta - mean * scale


def _he_normal(key, shape):      # HWIO
    fan_in = shape[0] * shape[1] * shape[2]
    return jax.random.normal(key, shape, jnp.float32) * float(np.sqrt(2.0 / fan_in))


def init_resnet18_params(key):
    keys = iter(jax.random.split(key, 64))

    def conv_p(cin, cout, k):
        return _he_normal(next(keys), (k, k, cin, cout))

    def bn_p(c):
        return dict(gamma=jnp.ones((c,), jnp.float32), beta=jnp.zeros((c,), jnp.float32),
                    mean=jnp.zeros((c,), jnp.float32), var=jnp.ones((c,), jnp.float32))

    params = {'conv1': conv_p(3, 64, 7), 'bn1': bn_p(64)}
    inplanes = 64
    cfg = [(64, 2, 1), (128, 2, 2), (256, 2, 2), (512, 2, 2)]   # resnet18: [2,2,2,2]
    layers = []
    for planes, blocks, stride in cfg:
        blks = []
        for b in range(blocks):
            s = stride if b == 0 else 1
            blk = dict(conv1=conv_p(inplanes, planes, 3), bn1=bn_p(planes),
                       conv2=conv_p(planes, planes, 3), bn2=bn_p(planes), stride=s)
            if s != 1 or inplanes != planes:
                blk['down_conv'] = conv_p(inplanes, planes, 1)
                blk['down_bn'] = bn_p(planes)
            blks.append(blk)
            inplanes = planes
        layers.append(blks)
    params['layers'] = layers
    return params


def resnet18_forward_pallas(params, x_nchw):
    x = jnp.transpose(x_nchw, (0, 2, 3, 1)).astype(jnp.float32)      # NHWC
    s, b = _bn_fold(**params['bn1'])
    x = conv_bn(x, params['conv1'], s, b, stride=2, padding=3, relu=True)
    x = maxpool2d(x)
    for blks in params['layers']:
        for blk in blks:
            st = blk['stride']
            if 'down_conv' in blk:
                ds, db = _bn_fold(**blk['down_bn'])
                identity = conv_bn(x, blk['down_conv'], ds, db,
                                   stride=st, padding=0, relu=False)
            else:
                identity = x
            s1, b1 = _bn_fold(**blk['bn1'])
            h = conv_bn(x, blk['conv1'], s1, b1, stride=st, padding=1, relu=True)
            s2, b2 = _bn_fold(**blk['bn2'])
            x = conv_bn(h, blk['conv2'], s2, b2, stride=1, padding=1,
                        relu=True, residual=identity)
    return jnp.transpose(x, (0, 3, 1, 2))                             # NCHW


# ----------------------------------------------------------------------------
# Pure-JAX reference (lax.conv / reduce_window) for verification
# ----------------------------------------------------------------------------

def _conv_ref(x, w, stride, padding):
    return lax.conv_general_dilated(
        x, w, (stride, stride), [(padding, padding), (padding, padding)],
        dimension_numbers=('NHWC', 'HWIO', 'NHWC'),
        precision=lax.Precision.HIGHEST)


def resnet18_forward_ref(params, x_nchw):
    x = jnp.transpose(x_nchw, (0, 2, 3, 1)).astype(jnp.float32)

    def cbr(x, w, bn, stride, padding, relu, residual=None):
        y = _conv_ref(x, w, stride, padding)
        s, b = _bn_fold(**bn)
        y = y * s + b
        if residual is not None:
            y = y + residual
        if relu:
            y = jnp.maximum(y, 0.0)
        return y

    x = cbr(x, params['conv1'], params['bn1'], 2, 3, True)
    x = lax.reduce_window(x, -jnp.inf, lax.max, (1, 3, 3, 1), (1, 2, 2, 1),
                          [(0, 0), (1, 1), (1, 1), (0, 0)])
    for blks in params['layers']:
        for blk in blks:
            st = blk['stride']
            identity = x
            if 'down_conv' in blk:
                identity = cbr(x, blk['down_conv'], blk['down_bn'], st, 0, False)
            h = cbr(x, blk['conv1'], blk['bn1'], st, 1, True)
            x = cbr(h, blk['conv2'], blk['bn2'], 1, 1, True, residual=identity)
    return jnp.transpose(x, (0, 3, 1, 2))


# ----------------------------------------------------------------------------

if __name__ == "__main__":
    key = jax.random.PRNGKey(0)
    kp, kx = jax.random.split(key)
    params = init_resnet18_params(kp)
    x = jax.random.normal(kx, (2, 3, 64, 64), jnp.float32)

    out = resnet18_forward_pallas(params, x)
    out = jax.block_until_ready(out)
    assert out.shape == (2, 512, 2, 2), out.shape

    ref = jax.block_until_ready(resnet18_forward_ref(params, x))
    assert np.allclose(np.asarray(out), np.asarray(ref), rtol=2e-2, atol=2e-3), (
        float(jnp.max(jnp.abs(out - ref))))
    print("KERNEL_OK")
</pallas_src>

<mosaic_0001>
module attributes {stable_mosaic.version = 11 : i64} {
  func.func @_gemm_bn_kernel(%arg0: i32, %arg1: i32, %arg2: memref<1x1024x147xf32, #tpu.memory_space<vmem>>, %arg3: memref<147x64xf32, #tpu.memory_space<vmem>>, %arg4: memref<1x64xf32, #tpu.memory_space<vmem>>, %arg5: memref<1x64xf32, #tpu.memory_space<vmem>>, %arg6: memref<1x1024x64xf32, #tpu.memory_space<vmem>>) attributes {dimension_semantics = [#tpu.dimension_semantics<parallel>, #tpu.dimension_semantics<parallel>], iteration_bounds = array<i64: 2, 1>, scalar_prefetch = 0 : i64, scratch_operands = 0 : i64, tpu.core_type = #tpu.core_type<tc>, window_params = [{transform_indices = @transform_0, window_bounds = array<i64: 1, 1024, 147>}, {transform_indices = @transform_1, window_bounds = array<i64: 147, 64>}, {transform_indices = @transform_2, window_bounds = array<i64: 1, 64>}, {transform_indices = @transform_3, window_bounds = array<i64: 1, 64>}, {transform_indices = @transform_4, window_bounds = array<i64: 1, 1024, 64>}]} {
    %c0 = arith.constant 0 : index
    %c0_0 = arith.constant 0 : index
    %c0_1 = arith.constant 0 : index
    %0 = vector.load %arg2[%c0, %c0_0, %c0_1] : memref<1x1024x147xf32, #tpu.memory_space<vmem>>, vector<1x1024x147xf32>
    %1 = vector.shape_cast %0 : vector<1x1024x147xf32> to vector<1024x147xf32>
    %c0_2 = arith.constant 0 : index
    %c0_3 = arith.constant 0 : index
    %2 = vector.load %arg3[%c0_2, %c0_3] : memref<147x64xf32, #tpu.memory_space<vmem>>, vector<147x64xf32>
    %cst = arith.constant dense<0.000000e+00> : vector<1024x64xf32>
    %3 = tpu.matmul %1, %2, %cst {dimension_numbers = #tpu.dot_dimension_numbers<[1], [0], [0], [1], [0, 0, 1, 1], [], []>} : vector<1024x147xf32>, vector<147x64xf32>, vector<1024x64xf32> -> vector<1024x64xf32>
    %c0_4 = arith.constant 0 : index
    %c0_5 = arith.constant 0 : index
    %4 = vector.load %arg4[%c0_4, %c0_5] : memref<1x64xf32, #tpu.memory_space<vmem>>, vector<1x64xf32>
    %5 = vector.broadcast %4 : vector<1x64xf32> to vector<1024x64xf32>
    %6 = arith.mulf %3, %5 : vector<1024x64xf32>
    %c0_6 = arith.constant 0 : index
    %c0_7 = arith.constant 0 : index
    %7 = vector.load %arg5[%c0_6, %c0_7] : memref<1x64xf32, #tpu.memory_space<vmem>>, vector<1x64xf32>
    %8 = vector.broadcast %7 : vector<1x64xf32> to vector<1024x64xf32>
    %9 = arith.addf %6, %8 : vector<1024x64xf32>
    %cst_8 = arith.constant 0.000000e+00 : f32
    %10 = vector.broadcast %cst_8 : f32 to vector<1024x64xf32>
    %11 = arith.maximumf %9, %10 : vector<1024x64xf32>
    %c0_9 = arith.constant 0 : index
    %c0_10 = arith.constant 0 : index
    %c0_11 = arith.constant 0 : index
    %12 = vector.load %arg6[%c0_9, %c0_10, %c0_11] : memref<1x1024x64xf32, #tpu.memory_space<vmem>>, vector<1x1024x64xf32>
    %13 = vector.shape_cast %12 : vector<1x1024x64xf32> to vector<1024x64xf32>
    %14 = vector.shape_cast %11 : vector<1024x64xf32> to vector<1x1024x64xf32>
    tpu.vector_store %arg6[%c0_9, %c0_10, %c0_11], %14 {strides = array<i32>} : memref<1x1024x64xf32, #tpu.memory_space<vmem>>, vector<1x1024x64xf32>,
    return
  }
  func.func @transform_0(%arg0: i32, %arg1: i32) -> (i32, i32, i32) {
    %c0_i32 = arith.constant 0 : i32
    %c0_i32_0 = arith.constant 0 : i32
    %c0_i32_1 = arith.constant 0 : i32
    return %arg0, %c0_i32, %c0_i32_0 : i32, i32, i32
  }
  func.func @transform_1(%arg0: i32, %arg1: i32) -> (i32, i32) {
    %c0_i32 = arith.constant 0 : i32
    %c0_i32_0 = arith.constant 0 : i32
    return %c0_i32, %arg1 : i32, i32
  }
  func.func @transform_2(%arg0: i32, %arg1: i32) -> (i32, i32) {
    %c0_i32 = arith.constant 0 : i32
    %c0_i32_0 = arith.constant 0 : i32
    return %c0_i32, %arg1 : i32, i32
  }
  func.func @transform_3(%arg0: i32, %arg1: i32) -> (i32, i32) {
    %c0_i32 = arith.constant 0 : i32
    %c0_i32_0 = arith.constant 0 : i32
    return %c0_i32, %arg1 : i32, i32
  }
  func.func @transform_4(%arg0: i32, %arg1: i32) -> (i32, i32, i32) {
    %c0_i32 = arith.constant 0 : i32
    %c0_i32_0 = arith.constant 0 : i32
    return %arg0, %c0_i32, %arg1 : i32, i32, i32
  }
}

</mosaic_0001>

<bundles_post_ra>
// kernel: tpu_custom_call.1
= control target key start
LH: loop header
LB: loop body
LE: loop exit
PB: predicated region body
PF: predicated region fallthrough
CT: control target
= control target key end

     0   :  { %s2549_s15 = smov 0   ;;  %s2551_s16 = smov 0   ;;  %s3581_s0 = inlined_call_operand.vmem [shape: f32[2,1024,147], index: 0, kind: input, shape index: {}]   ;;  %s3582_s1 = inlined_call_operand.vmem [shape: f32[147,64], index: 1, kind: input, shape index: {}]   ;;  %s3583_s2 = inlined_call_operand.vmem [shape: f32[1,64], index: 2, kind: input, shape index: {}]   ;;  %s3584_s3 = inlined_call_operand.vmem [shape: f32[1,64], index: 3, kind: input, shape index: {}]   ;;  %s3585_s4 = inlined_call_operand.vmem [shape: f32[2,1024,64], index: 4, kind: output, shape index: {}]  }
   0x1   :  { %s2553_s17 = smov 0  }
   0x2 LB: > { %s26_s18 = sadd.s32 1, %s2516_s16  ;;  %p2283_p0 = scmp.ge.s32.totalorder %s2520_s17, 1  ;;  %s2520_s17 = sphi %s2553_s17, %s14_s17   ;;  %s2516_s16 = sphi %s2551_s16, %s3587_s16   ;;  %s2512_s15 = sphi %s2549_s15, %s3586_s15  }
   0x3   : > { %p28_p1 = scmp.ge.s32.totalorder %s26_s18, 2  ;;  %p201_p2 = scmp.lt.s32.totalorder %s2520_s17, 3 }
   0x5   : > { %s3589_s18 = smov (%p28_p1, %s26_s18), 0  ;;  %p202_p3 = pnand %p2283_p0, %p201_p2 }
   0x6   : > { %v519_v0 = vld [vmem:[%s3582_s1] sm:$0xff] (!%p202_p3)  ;;  %v520_v1 = vld [vmem:[%s3582_s1 + $0x8] sm:$0xff] (!%p202_p3)  ;;  %v521_v2 = vld [vmem:[%s3582_s1 + $0x10] sm:$0xff] (!%p202_p3)  ;;  %v2522_v3 = vmov (!%p202_p3), 0.0|0.0   ;;  %p240_p4 = scmp.lt.s32.totalorder (!%p202_p3), %s2512_s15, 1  ;;  %vm538_vm0 = vcmask (!%p202_p3), 154624  }
   0x7   : > { %205 = sbr.rel (%p202_p3) target bundleno = 517 (0x205), region = 36  ;;  %2423 = vmatprep.subr.bf16.mxu0 (!%p202_p3), %v2522_v3  ;;  %2450 = vmatprep.subr.bf16.mxu1 (!%p202_p3), %v2522_v3  ;;  %v2424_v4 = vpack.c.bf16 (!%p202_p3), %v520_v1, %v519_v0  ;;  %v522_v5 = vld [vmem:[%s3582_s1 + $0x18] sm:$0xff] (!%p202_p3)  ;;  %v523_v7 = vld [vmem:[%s3582_s1 + $0x20] sm:$0xff] (!%p202_p3)  ;;  %v524_v8 = vld [vmem:[%s3582_s1 + $0x28] sm:$0xff] (!%p202_p3)  ;;  %v2523_v30 = vmov (!%p202_p3), 0.0   ;;  %vm923_vm1 = vcmask (!%p202_p3), 1042432  }
   0x8   : > { %v2427_v6 = vpack.c.bf16 (!%p202_p3), %v522_v5, %v521_v2  ;;  %v2430_v9 = vpack.c.bf16 (!%p202_p3), %v524_v8, %v523_v7  ;;  %v525_v12 = vld [vmem:[%s3582_s1 + $0x30] sm:$0xff] (!%p202_p3)  ;;  %v526_v13 = vld [vmem:[%s3582_s1 + $0x38] sm:$0xff] (!%p202_p3)  ;;  %v527_v15 = vld [vmem:[%s3582_s1 + $0x40] sm:$0xff] (!%p202_p3)  ;;  %vm2030_vm2 = vcmask (!%p202_p3), 523264  }
   0x9   : > { %2425 = vmatpush1.bf16.msra.mxu0 (!%p202_p3), %v2424_v4  ;;  %2460 = vmatpush1.bf16.msra.mxu1 (!%p202_p3), %v2424_v4  ;;  %v2433_v14 = vpack.c.bf16 (!%p202_p3), %v526_v13, %v525_v12  ;;  %v528_v16 = vld [vmem:[%s3582_s1 + $0x48] sm:$0xff] (!%p202_p3)  ;;  %v529_v18 = vld [vmem:[%s3582_s1 + $0x50] sm:$0xff] (!%p202_p3)  ;;  %v530_v19 = vld [vmem:[%s3582_s1 + $0x58] sm:$0xff] (!%p202_p3) }
   0xa   : > { %2426 = vmatprep.subr.bf16.mxu0 (!%p202_p3), %v2522_v3  ;;  %2451 = vmatprep.subr.bf16.mxu1 (!%p202_p3), %v2522_v3  ;;  %v2436_v17 = vpack.c.bf16 (!%p202_p3), %v528_v16, %v527_v15  ;;  %v2439_v20 = vpack.c.bf16 (!%p202_p3), %v530_v19, %v529_v18  ;;  %v531_v21 = vld [vmem:[%s3582_s1 + $0x60] sm:$0xff] (!%p202_p3)  ;;  %v532_v22 = vld [vmem:[%s3582_s1 + $0x68] sm:$0xff] (!%p202_p3)  ;;  %v533_v24 = vld [vmem:[%s3582_s1 + $0x70] sm:$0xff] (!%p202_p3) }
   0xb   : > { %v2442_v23 = vpack.c.bf16 (!%p202_p3), %v532_v22, %v531_v21  ;;  %v534_v25 = vld [vmem:[%s3582_s1 + $0x78] sm:$0xff] (!%p202_p3)  ;;  %v535_v27 = vld [vmem:[%s3582_s1 + $0x80] sm:$0xff] (!%p202_p3)  ;;  %v536_v28 = vld [vmem:[%s3582_s1 + $0x88] sm:$0xff] (!%p202_p3) }
   0xc   : > { %v2445_v26 = vpack.c.bf16 (!%p202_p3), %v534_v25, %v533_v24  ;;  %v2448_v29 = vpack.c.bf16 (!%p202_p3), %v536_v28, %v535_v27  ;;  %v537_v31 = vld [vmem:[%s3582_s1 + $0x90] sm:$0x7] (!%p202_p3) }
   0xd   : > { %2428 = vmatpush1.bf16.msra.mxu0 (!%p202_p3), %v2427_v6  ;;  %2461 = vmatpush1.bf16.msra.mxu1 (!%p202_p3), %v2427_v6 }
   0xe   : > { %s3591_s15 = smov (!%p240_p4, %s2512_s15), 1  ;;  %2429 = vmatprep.subr.bf16.mxu0 %v2522_v3  ;;  %2452 = vmatprep.subr.bf16.mxu1 %v2522_v3 }
   0xf   : > { %s2421_s5 = sshll.u32 %s3591_s15, 11  ;;  %s2422_s22 = sshll.u32 %s3591_s15, 10 }
  0x10   : > { %s2595_s8 = scalar_lea.vmem %s3581_s0, %s2421_s5  ;;  %s3000_s24 = scalar_lea.vmem %s3585_s4, %s2422_s22 }
  0x11   : > { %v264_v10 = vld [vmem:[%s2595_s8 + $0x8] sm:$0xff]  ;;  %2431 = vmatpush1.bf16.msra.mxu0 %v2430_v9  ;;  %2462 = vmatpush1.bf16.msra.mxu1 %v2430_v9  ;;  %v263_v32 = vld [vmem:[%s2595_s8] sm:$0xff]  ;;  %v266_v34 = vld [vmem:[%s2595_s8 + $0x18] sm:$0xff] }
  0x12   : > { %v392_v11 = vld [vmem:[%s2595_s8 + $0x408] sm:$0xff]  ;;  %2289 = vmatprep.mubr.msk.f32.mxu0 %vm538_vm0, %v264_v10  ;;  %2432 = vmatprep.subr.bf16.mxu0 %v2522_v3  ;;  %v391_v33 = vld [vmem:[%s2595_s8 + $0x400] sm:$0xff]  ;;  %v394_v35 = vld [vmem:[%s2595_s8 + $0x418] sm:$0xff] }
  0x13   : > { %2353 = vmatprep.mubr.msk.f32.mxu1 %vm538_vm0, %v392_v11  ;;  %2453 = vmatprep.subr.bf16.mxu1 %v2522_v3  ;;  %v265_v36 = vld [vmem:[%s2595_s8 + $0x10] sm:$0xff]  ;;  %v268_v38 = vld [vmem:[%s2595_s8 + $0x28] sm:$0xff]  ;;  %v267_v40 = vld [vmem:[%s2595_s8 + $0x20] sm:$0xff] }
  0x14   : > { %v393_v37 = vld [vmem:[%s2595_s8 + $0x410] sm:$0xff]  ;;  %v396_v39 = vld [vmem:[%s2595_s8 + $0x428] sm:$0xff]  ;;  %v395_v41 = vld [vmem:[%s2595_s8 + $0x420] sm:$0xff] }
  0x15   : > { %2434 = vmatpush1.bf16.msra.mxu0 %v2433_v14  ;;  %2463 = vmatpush1.bf16.msra.mxu1 %v2433_v14  ;;  %v270_v42 = vld [vmem:[%s2595_s8 + $0x38] sm:$0xff]  ;;  %v269_v44 = vld [vmem:[%s2595_s8 + $0x30] sm:$0xff]  ;;  %v272_v46 = vld [vmem:[%s2595_s8 + $0x48] sm:$0xff] }
  0x16   : > { %2435 = vmatprep.subr.bf16.mxu0 %v2522_v3  ;;  %2454 = vmatprep.subr.bf16.mxu1 %v2522_v3  ;;  %v398_v43 = vld [vmem:[%s2595_s8 + $0x438] sm:$0xff]  ;;  %v397_v45 = vld [vmem:[%s2595_s8 + $0x430] sm:$0xff]  ;;  %v400_v47 = vld [vmem:[%s2595_s8 + $0x448] sm:$0xff] }
  0x17   : > { %v271_v48 = vld [vmem:[%s2595_s8 + $0x40] sm:$0xff]  ;;  %v274_v50 = vld [vmem:[%s2595_s8 + $0x58] sm:$0xff]  ;;  %v273_v52 = vld [vmem:[%s2595_s8 + $0x50] sm:$0xff] }
  0x18   : > { %v399_v49 = vld [vmem:[%s2595_s8 + $0x440] sm:$0xff]  ;;  %v402_v51 = vld [vmem:[%s2595_s8 + $0x458] sm:$0xff]  ;;  %v401_v53 = vld [vmem:[%s2595_s8 + $0x450] sm:$0xff] }
  0x19   : > { %2437 = vmatpush1.bf16.msra.mxu0 %v2436_v17  ;;  %2464 = vmatpush1.bf16.msra.mxu1 %v2436_v17  ;;  %v276_v54 = vld [vmem:[%s2595_s8 + $0x68] sm:$0xff]  ;;  %v275_v56 = vld [vmem:[%s2595_s8 + $0x60] sm:$0xff]  ;;  %v278_v58 = vld [vmem:[%s2595_s8 + $0x78] sm:$0xff] }
  0x1a   : > { %2438 = vmatprep.subr.bf16.mxu0 %v2522_v3  ;;  %2455 = vmatprep.subr.bf16.mxu1 %v2522_v3  ;;  %v404_v55 = vld [vmem:[%s2595_s8 + $0x468] sm:$0xff]  ;;  %v403_v57 = vld [vmem:[%s2595_s8 + $0x460] sm:$0xff]  ;;  %v406_v59 = vld [vmem:[%s2595_s8 + $0x478] sm:$0xff] }
  0x1b   : > { %v277_v60 = vld [vmem:[%s2595_s8 + $0x70] sm:$0xff]  ;;  %v280_v62 = vld [vmem:[%s2595_s8 + $0x88] sm:$0xff]  ;;  %v279_v0 = vld [vmem:[%s2595_s8 + $0x80] sm:$0xff] }
  0x1c   : > { %v405_v61 = vld [vmem:[%s2595_s8 + $0x470] sm:$0xff]  ;;  %v408_v63 = vld [vmem:[%s2595_s8 + $0x488] sm:$0xff]  ;;  %v407_v1 = vld [vmem:[%s2595_s8 + $0x480] sm:$0xff] }
  0x1d   : > { %2440 = vmatpush1.bf16.msra.mxu0 %v2439_v20  ;;  %2465 = vmatpush1.bf16.msra.mxu1 %v2439_v20  ;;  %v282_v2 = vld [vmem:[%s2595_s8 + $0x98] sm:$0xff]  ;;  %v281_v4 = vld [vmem:[%s2595_s8 + $0x90] sm:$0xff]  ;;  %v284_v6 = vld [vmem:[%s2595_s8 + $0xa8] sm:$0xff] }
  0x1e   : > { %2441 = vmatprep.subr.bf16.mxu0 %v2522_v3  ;;  %2456 = vmatprep.subr.bf16.mxu1 %v2522_v3  ;;  %v409_v5 = vld [vmem:[%s2595_s8 + $0x490] sm:$0xff]  ;;  %v412_v7 = vld [vmem:[%s2595_s8 + $0x4a8] sm:$0xff]  ;;  %v283_v8 = vld [vmem:[%s2595_s8 + $0xa0] sm:$0xff] }
  0x1f   : > { %v411_v9 = vld [vmem:[%s2595_s8 + $0x4a0] sm:$0xff]  ;;  %v286_v10 = vld [vmem:[%s2595_s8 + $0xb8] sm:$0xff]  ;;  %v285_v12 = vld [vmem:[%s2595_s8 + $0xb0] sm:$0xff] }
  0x20   : > { %v414_v11 = vld [vmem:[%s2595_s8 + $0x4b8] sm:$0xff]  ;;  %v413_v13 = vld [vmem:[%s2595_s8 + $0x4b0] sm:$0xff]  ;;  %v288_v14 = vld [vmem:[%s2595_s8 + $0xc8] sm:$0xff] }
  0x21   : > { %2443 = vmatpush1.bf16.msra.mxu0 %v2442_v23  ;;  %2466 = vmatpush1.bf16.msra.mxu1 %v2442_v23  ;;  %v416_v15 = vld [vmem:[%s2595_s8 + $0x4c8] sm:$0xff]  ;;  %v287_v16 = vld [vmem:[%s2595_s8 + $0xc0] sm:$0xff]  ;;  %v290_v18 = vld [vmem:[%s2595_s8 + $0xd8] sm:$0xff] }
  0x22   : > { %2444 = vmatprep.subr.bf16.mxu0 %v2522_v3  ;;  %2457 = vmatprep.subr.bf16.mxu1 %v2522_v3  ;;  %v415_v17 = vld [vmem:[%s2595_s8 + $0x4c0] sm:$0xff]  ;;  %v418_v19 = vld [vmem:[%s2595_s8 + $0x4d8] sm:$0xff]  ;;  %v289_v20 = vld [vmem:[%s2595_s8 + $0xd0] sm:$0xff] }
  0x23   : > { %v417_v21 = vld [vmem:[%s2595_s8 + $0x4d0] sm:$0xff]  ;;  %v292_v22 = vld [vmem:[%s2595_s8 + $0xe8] sm:$0xff]  ;;  %v291_v24 = vld [vmem:[%s2595_s8 + $0xe0] sm:$0xff] }
  0x24   : > { %v420_v23 = vld [vmem:[%s2595_s8 + $0x4e8] sm:$0xff]  ;;  %v419_v25 = vld [vmem:[%s2595_s8 + $0x4e0] sm:$0xff]  ;;  %v422_v27 = vld [vmem:[%s2595_s8 + $0x4f8] sm:$0xff] }
  0x25   : > { %2446 = vmatpush1.bf16.msra.mxu0 %v2445_v26  ;;  %2467 = vmatpush1.bf16.msra.mxu1 %v2445_v26  ;;  %v294_v26 = vld [vmem:[%s2595_s8 + $0xf8] sm:$0xff]  ;;  %v293_v28 = vld [vmem:[%s2595_s8 + $0xf0] sm:$0xff] }
  0x26   : > { %2447 = vmatprep.subr.bf16.mxu0 %v2522_v3  ;;  %2458 = vmatprep.subr.bf16.mxu1 %v2522_v3  ;;  %v410_v3 = vld [vmem:[%s2595_s8 + $0x498] sm:$0xff] }
  0x29   : > { %2449 = vmatpush1.bf16.msra.mxu0 %v2448_v29  ;;  %2468 = vmatpush1.bf16.msra.mxu1 %v2448_v29  ;;  %v421_v29 = vld [vmem:[%s2595_s8 + $0x4f0] sm:$0xff] }
  0x2a   : > { %963 = vmatprep.subr.mxu0 %v2523_v30  ;;  %2459 = vmatprep.subr.mxu1 %v2523_v30  ;;  %v296_v30 = vld [vmem:[%s2595_s8 + $0x108] sm:$0xff] }
  0x2d   : > { %2288 = vmatpush1.msk.msra.mxu0 %vm923_vm1, %v537_v31  ;;  %2469 = vmatpush1.msk.msra.mxu1 %vm923_vm1, %v537_v31  ;;  %v424_v31 = vld [vmem:[%s2595_s8 + $0x508] sm:$0xff] }
  0x2e   : > { %992 = vmatmul.mubr.f32.vlgmr.msra.gmra.mrb[0].mxu0 %v263_v32  ;;  %1312 = vmatmul.mubr.f32.vlgmr.msra.gmra.mrb[0].mxu1 %v391_v33  ;;  %v295_v32 = vld [vmem:[%s2595_s8 + $0x100] sm:$0xff] }
  0x2f   : > { %2290 = vmatprep.mubr.msk.f32.mxu0 %vm538_vm0, %v266_v34  ;;  %2354 = vmatprep.mubr.msk.f32.mxu1 %vm538_vm0, %v394_v35  ;;  %v423_v33 = vld [vmem:[%s2595_s8 + $0x500] sm:$0xff]  ;;  %v298_v34 = vld [vmem:[%s2595_s8 + $0x118] sm:$0xff] }
  0x30   : > { %v426_v35 = vld [vmem:[%s2595_s8 + $0x518] sm:$0xff] }
  0x32   : > { %997 = vmatmul.mubr.f32.gmra.mrb[2].mxu0 %v265_v36  ;;  %1317 = vmatmul.mubr.f32.gmra.mrb[2].mxu1 %v393_v37  ;;  %v297_v36 = vld [vmem:[%s2595_s8 + $0x110] sm:$0xff] }
  0x33   : > { %2291 = vmatprep.mubr.msk.f32.mxu0 %vm538_vm0, %v268_v38  ;;  %2355 = vmatprep.mubr.msk.f32.mxu1 %vm538_vm0, %v396_v39  ;;  %v425_v37 = vld [vmem:[%s2595_s8 + $0x510] sm:$0xff]  ;;  %v300_v38 = vld [vmem:[%s2595_s8 + $0x128] sm:$0xff] }
  0x34   : > { %v428_v39 = vld [vmem:[%s2595_s8 + $0x528] sm:$0xff] }
  0x36   : > { %1002 = vmatmul.mubr.f32.gmra.mrb[4].mxu0 %v267_v40  ;;  %1322 = vmatmul.mubr.f32.gmra.mrb[4].mxu1 %v395_v41  ;;  %v299_v40 = vld [vmem:[%s2595_s8 + $0x120] sm:$0xff] }
  0x37   : > { %2292 = vmatprep.mubr.msk.f32.mxu0 %vm538_vm0, %v270_v42  ;;  %2356 = vmatprep.mubr.msk.f32.mxu1 %vm538_vm0, %v398_v43  ;;  %v427_v41 = vld [vmem:[%s2595_s8 + $0x520] sm:$0xff]  ;;  %v302_v42 = vld [vmem:[%s2595_s8 + $0x138] sm:$0xff] }
  0x38   : > { %v430_v43 = vld [vmem:[%s2595_s8 + $0x538] sm:$0xff] }
  0x3a   : > { %1007 = vmatmul.mubr.f32.gmra.mrb[6].mxu0 %v269_v44  ;;  %1327 = vmatmul.mubr.f32.gmra.mrb[6].mxu1 %v397_v45  ;;  %v301_v44 = vld [vmem:[%s2595_s8 + $0x130] sm:$0xff] }
  0x3b   : > { %2293 = vmatprep.mubr.msk.f32.mxu0 %vm538_vm0, %v272_v46  ;;  %2357 = vmatprep.mubr.msk.f32.mxu1 %vm538_vm0, %v400_v47  ;;  %v429_v45 = vld [vmem:[%s2595_s8 + $0x530] sm:$0xff]  ;;  %v304_v46 = vld [vmem:[%s2595_s8 + $0x148] sm:$0xff] }
  0x3c   : > { %v432_v47 = vld [vmem:[%s2595_s8 + $0x548] sm:$0xff] }
  0x3e   : > { %1012 = vmatmul.mubr.f32.gmra.mrb[8].mxu0 %v271_v48  ;;  %1332 = vmatmul.mubr.f32.gmra.mrb[8].mxu1 %v399_v49  ;;  %v303_v48 = vld [vmem:[%s2595_s8 + $0x140] sm:$0xff] }
  0x3f   : > { %2294 = vmatprep.mubr.msk.f32.mxu0 %vm538_vm0, %v274_v50  ;;  %2358 = vmatprep.mubr.msk.f32.mxu1 %vm538_vm0, %v402_v51  ;;  %v431_v49 = vld [vmem:[%s2595_s8 + $0x540] sm:$0xff]  ;;  %v306_v50 = vld [vmem:[%s2595_s8 + $0x158] sm:$0xff] }
  0x40   : > { %v434_v51 = vld [vmem:[%s2595_s8 + $0x558] sm:$0xff] }
  0x42   : > { %1017 = vmatmul.mubr.f32.gmra.mrb[10].mxu0 %v273_v52  ;;  %1337 = vmatmul.mubr.f32.gmra.mrb[10].mxu1 %v401_v53  ;;  %v305_v52 = vld [vmem:[%s2595_s8 + $0x150] sm:$0xff] }
  0x43   : > { %2295 = vmatprep.mubr.msk.f32.mxu0 %vm538_vm0, %v276_v54  ;;  %2359 = vmatprep.mubr.msk.f32.mxu1 %vm538_vm0, %v404_v55  ;;  %v433_v53 = vld [vmem:[%s2595_s8 + $0x550] sm:$0xff]  ;;  %v308_v54 = vld [vmem:[%s2595_s8 + $0x168] sm:$0xff] }
  0x44   : > { %v436_v55 = vld [vmem:[%s2595_s8 + $0x568] sm:$0xff] }
  0x46   : > { %1022 = vmatmul.mubr.f32.gmra.mrb[12].mxu0 %v275_v56  ;;  %1342 = vmatmul.mubr.f32.gmra.mrb[12].mxu1 %v403_v57  ;;  %v307_v56 = vld [vmem:[%s2595_s8 + $0x160] sm:$0xff] }
  0x47   : > { %2296 = vmatprep.mubr.msk.f32.mxu0 %vm538_vm0, %v278_v58  ;;  %2360 = vmatprep.mubr.msk.f32.mxu1 %vm538_vm0, %v406_v59  ;;  %v435_v57 = vld [vmem:[%s2595_s8 + $0x560] sm:$0xff]  ;;  %v310_v58 = vld [vmem:[%s2595_s8 + $0x178] sm:$0xff] }
  0x48   : > { %v438_v59 = vld [vmem:[%s2595_s8 + $0x578] sm:$0xff] }
  0x4a   : > { %1027 = vmatmul.mubr.f32.gmra.mrb[14].mxu0 %v277_v60  ;;  %1347 = vmatmul.mubr.f32.gmra.mrb[14].mxu1 %v405_v61  ;;  %v309_v60 = vld [vmem:[%s2595_s8 + $0x170] sm:$0xff] }
  0x4b   : > { %2297 = vmatprep.mubr.msk.f32.mxu0 %vm538_vm0, %v280_v62  ;;  %2361 = vmatprep.mubr.msk.f32.mxu1 %vm538_vm0, %v408_v63  ;;  %v437_v61 = vld [vmem:[%s2595_s8 + $0x570] sm:$0xff]  ;;  %v312_v62 = vld [vmem:[%s2595_s8 + $0x188] sm:$0xff] }
  0x4c   : > { %v440_v63 = vld [vmem:[%s2595_s8 + $0x588] sm:$0xff] }
  0x4e   : > { %1032 = vmatmul.mubr.f32.gmra.mrb[16].mxu0 %v279_v0  ;;  %1352 = vmatmul.mubr.f32.gmra.mrb[16].mxu1 %v407_v1  ;;  %v311_v0 = vld [vmem:[%s2595_s8 + $0x180] sm:$0xff] }
  0x4f   : > { %2298 = vmatprep.mubr.msk.f32.mxu0 %vm538_vm0, %v282_v2  ;;  %2362 = vmatprep.mubr.msk.f32.mxu1 %vm538_vm0, %v410_v3  ;;  %v439_v1 = vld [vmem:[%s2595_s8 + $0x580] sm:$0xff]  ;;  %v314_v2 = vld [vmem:[%s2595_s8 + $0x198] sm:$0xff] }
  0x50   : > { %v442_v3 = vld [vmem:[%s2595_s8 + $0x598] sm:$0xff] }
  0x52   : > { %1037 = vmatmul.mubr.f32.gmra.mrb[18].mxu0 %v281_v4  ;;  %1357 = vmatmul.mubr.f32.gmra.mrb[18].mxu1 %v409_v5  ;;  %v313_v4 = vld [vmem:[%s2595_s8 + $0x190] sm:$0xff] }
  0x53   : > { %2299 = vmatprep.mubr.msk.f32.mxu0 %vm538_vm0, %v284_v6  ;;  %2363 = vmatprep.mubr.msk.f32.mxu1 %vm538_vm0, %v412_v7  ;;  %v441_v5 = vld [vmem:[%s2595_s8 + $0x590] sm:$0xff]  ;;  %v316_v6 = vld [vmem:[%s2595_s8 + $0x1a8] sm:$0xff] }
  0x54   : > { %v444_v7 = vld [vmem:[%s2595_s8 + $0x5a8] sm:$0xff] }
  0x56   : > { %1042 = vmatmul.mubr.f32.gmra.mrb[20].mxu0 %v283_v8  ;;  %1362 = vmatmul.mubr.f32.gmra.mrb[20].mxu1 %v411_v9  ;;  %v315_v8 = vld [vmem:[%s2595_s8 + $0x1a0] sm:$0xff] }
  0x57   : > { %2300 = vmatprep.mubr.msk.f32.mxu0 %vm538_vm0, %v286_v10  ;;  %2364 = vmatprep.mubr.msk.f32.mxu1 %vm538_vm0, %v414_v11  ;;  %v443_v9 = vld [vmem:[%s2595_s8 + $0x5a0] sm:$0xff]  ;;  %v318_v10 = vld [vmem:[%s2595_s8 + $0x1b8] sm:$0xff] }
  0x58   : > { %v446_v11 = vld [vmem:[%s2595_s8 + $0x5b8] sm:$0xff] }
  0x5a   : > { %1047 = vmatmul.mubr.f32.gmra.mrb[22].mxu0 %v285_v12  ;;  %1367 = vmatmul.mubr.f32.gmra.mrb[22].mxu1 %v413_v13  ;;  %v317_v12 = vld [vmem:[%s2595_s8 + $0x1b0] sm:$0xff] }
  0x5b   : > { %2301 = vmatprep.mubr.msk.f32.mxu0 %vm538_vm0, %v288_v14  ;;  %2365 = vmatprep.mubr.msk.f32.mxu1 %vm538_vm0, %v416_v15  ;;  %v445_v13 = vld [vmem:[%s2595_s8 + $0x5b0] sm:$0xff]  ;;  %v320_v14 = vld [vmem:[%s2595_s8 + $0x1c8] sm:$0xff] }
  0x5c   : > { %v448_v15 = vld [vmem:[%s2595_s8 + $0x5c8] sm:$0xff] }
  0x5e   : > { %1052 = vmatmul.mubr.f32.gmra.mrb[24].mxu0 %v287_v16  ;;  %1372 = vmatmul.mubr.f32.gmra.mrb[24].mxu1 %v415_v17  ;;  %v319_v16 = vld [vmem:[%s2595_s8 + $0x1c0] sm:$0xff] }
  0x5f   : > { %2302 = vmatprep.mubr.msk.f32.mxu0 %vm538_vm0, %v290_v18  ;;  %2366 = vmatprep.mubr.msk.f32.mxu1 %vm538_vm0, %v418_v19  ;;  %v447_v17 = vld [vmem:[%s2595_s8 + $0x5c0] sm:$0xff]  ;;  %v322_v18 = vld [vmem:[%s2595_s8 + $0x1d8] sm:$0xff] }
  0x60   : > { %v450_v19 = vld [vmem:[%s2595_s8 + $0x5d8] sm:$0xff] }
  0x62   : > { %1057 = vmatmul.mubr.f32.gmra.mrb[26].mxu0 %v289_v20  ;;  %1377 = vmatmul.mubr.f32.gmra.mrb[26].mxu1 %v417_v21  ;;  %v321_v20 = vld [vmem:[%s2595_s8 + $0x1d0] sm:$0xff] }
  0x63   : > { %2303 = vmatprep.mubr.msk.f32.mxu0 %vm538_vm0, %v292_v22  ;;  %2367 = vmatprep.mubr.msk.f32.mxu1 %vm538_vm0, %v420_v23  ;;  %v449_v21 = vld [vmem:[%s2595_s8 + $0x5d0] sm:$0xff]  ;;  %v324_v22 = vld [vmem:[%s2595_s8 + $0x1e8] sm:$0xff] }
  0x64   : > { %v452_v23 = vld [vmem:[%s2595_s8 + $0x5e8] sm:$0xff] }
  0x66   : > { %1062 = vmatmul.mubr.f32.gmra.mrb[28].mxu0 %v291_v24  ;;  %1382 = vmatmul.mubr.f32.gmra.mrb[28].mxu1 %v419_v25  ;;  %v323_v24 = vld [vmem:[%s2595_s8 + $0x1e0] sm:$0xff] }
  0x67   : > { %2304 = vmatprep.mubr.msk.f32.mxu0 %vm538_vm0, %v294_v26  ;;  %2368 = vmatprep.mubr.msk.f32.mxu1 %vm538_vm0, %v422_v27  ;;  %v451_v25 = vld [vmem:[%s2595_s8 + $0x5e0] sm:$0xff]  ;;  %v326_v26 = vld [vmem:[%s2595_s8 + $0x1f8] sm:$0xff] }
  0x68   : > { %v454_v27 = vld [vmem:[%s2595_s8 + $0x5f8] sm:$0xff] }
  0x6a   : > { %1067 = vmatmul.mubr.f32.gmra.mrb[30].mxu0 %v293_v28  ;;  %1387 = vmatmul.mubr.f32.gmra.mrb[30].mxu1 %v421_v29  ;;  %v325_v28 = vld [vmem:[%s2595_s8 + $0x1f0] sm:$0xff] }
  0x6b   : > { %2305 = vmatprep.mubr.msk.f32.mxu0 %vm538_vm0, %v296_v30  ;;  %2369 = vmatprep.mubr.msk.f32.mxu1 %vm538_vm0, %v424_v31  ;;  %v453_v29 = vld [vmem:[%s2595_s8 + $0x5f0] sm:$0xff]  ;;  %v328_v30 = vld [vmem:[%s2595_s8 + $0x208] sm:$0xff] }
  0x6c   : > { %v456_v31 = vld [vmem:[%s2595_s8 + $0x608] sm:$0xff] }
  0x6e   : > { %1072 = vmatmul.mubr.f32.gmra.mrb[32].mxu0 %v295_v32  ;;  %1392 = vmatmul.mubr.f32.gmra.mrb[32].mxu1 %v423_v33  ;;  %v327_v32 = vld [vmem:[%s2595_s8 + $0x200] sm:$0xff] }
  0x6f   : > { %2306 = vmatprep.mubr.msk.f32.mxu0 %vm538_vm0, %v298_v34  ;;  %2370 = vmatprep.mubr.msk.f32.mxu1 %vm538_vm0, %v426_v35  ;;  %v455_v33 = vld [vmem:[%s2595_s8 + $0x600] sm:$0xff]  ;;  %v330_v34 = vld [vmem:[%s2595_s8 + $0x218] sm:$0xff] }
  0x70   : > { %v458_v35 = vld [vmem:[%s2595_s8 + $0x618] sm:$0xff] }
  0x72   : > { %1077 = vmatmul.mubr.f32.gmra.mrb[34].mxu0 %v297_v36  ;;  %1397 = vmatmul.mubr.f32.gmra.mrb[34].mxu1 %v425_v37  ;;  %v329_v36 = vld [vmem:[%s2595_s8 + $0x210] sm:$0xff] }
  0x73   : > { %2307 = vmatprep.mubr.msk.f32.mxu0 %vm538_vm0, %v300_v38  ;;  %2371 = vmatprep.mubr.msk.f32.mxu1 %vm538_vm0, %v428_v39  ;;  %v457_v37 = vld [vmem:[%s2595_s8 + $0x610] sm:$0xff]  ;;  %v332_v38 = vld [vmem:[%s2595_s8 + $0x228] sm:$0xff] }
  0x74   : > { %v460_v39 = vld [vmem:[%s2595_s8 + $0x628] sm:$0xff] }
  0x76   : > { %1082 = vmatmul.mubr.f32.gmra.mrb[36].mxu0 %v299_v40  ;;  %1402 = vmatmul.mubr.f32.gmra.mrb[36].mxu1 %v427_v41  ;;  %v331_v40 = vld [vmem:[%s2595_s8 + $0x220] sm:$0xff] }
  0x77   : > { %2308 = vmatprep.mubr.msk.f32.mxu0 %vm538_vm0, %v302_v42  ;;  %2372 = vmatprep.mubr.msk.f32.mxu1 %vm538_vm0, %v430_v43  ;;  %v459_v41 = vld [vmem:[%s2595_s8 + $0x620] sm:$0xff]  ;;  %v334_v42 = vld [vmem:[%s2595_s8 + $0x238] sm:$0xff] }
  0x78   : > { %v462_v43 = vld [vmem:[%s2595_s8 + $0x638] sm:$0xff] }
  0x7a   : > { %1087 = vmatmul.mubr.f32.gmra.mrb[38].mxu0 %v301_v44  ;;  %1407 = vmatmul.mubr.f32.gmra.mrb[38].mxu1 %v429_v45  ;;  %v333_v44 = vld [vmem:[%s2595_s8 + $0x230] sm:$0xff] }
  0x7b   : > { %2309 = vmatprep.mubr.msk.f32.mxu0 %vm538_vm0, %v304_v46  ;;  %2373 = vmatprep.mubr.msk.f32.mxu1 %vm538_vm0, %v432_v47  ;;  %v461_v45 = vld [vmem:[%s2595_s8 + $0x630] sm:$0xff]  ;;  %v336_v46 = vld [vmem:[%s2595_s8 + $0x248] sm:$0xff] }
  0x7c   : > { %v464_v47 = vld [vmem:[%s2595_s8 + $0x648] sm:$0xff] }
  0x7e   : > { %1092 = vmatmul.mubr.f32.gmra.mrb[40].mxu0 %v303_v48  ;;  %1412 = vmatmul.mubr.f32.gmra.mrb[40].mxu1 %v431_v49  ;;  %v335_v48 = vld [vmem:[%s2595_s8 + $0x240] sm:$0xff] }
  0x7f   : > { %2310 = vmatprep.mubr.msk.f32.mxu0 %vm538_vm0, %v306_v50  ;;  %2374 = vmatprep.mubr.msk.f32.mxu1 %vm538_vm0, %v434_v51  ;;  %v463_v49 = vld [vmem:[%s2595_s8 + $0x640] sm:$0xff]  ;;  %v338_v50 = vld [vmem:[%s2595_s8 + $0x258] sm:$0xff] }
  0x80   : > { %v466_v51 = vld [vmem:[%s2595_s8 + $0x658] sm:$0xff] }
  0x82   : > { %1097 = vmatmul.mubr.f32.gmra.mrb[42].mxu0 %v305_v52  ;;  %1417 = vmatmul.mubr.f32.gmra.mrb[42].mxu1 %v433_v53  ;;  %v337_v52 = vld [vmem:[%s2595_s8 + $0x250] sm:$0xff] }
  0x83   : > { %2311 = vmatprep.mubr.msk.f32.mxu0 %vm538_vm0, %v308_v54  ;;  %2375 = vmatprep.mubr.msk.f32.mxu1 %vm538_vm0, %v436_v55  ;;  %v465_v53 = vld [vmem:[%s2595_s8 + $0x650] sm:$0xff]  ;;  %v340_v54 = vld [vmem:[%s2595_s8 + $0x268] sm:$0xff] }
  0x84   : > { %v468_v55 = vld [vmem:[%s2595_s8 + $0x668] sm:$0xff] }
  0x86   : > { %1102 = vmatmul.mubr.f32.gmra.mrb[44].mxu0 %v307_v56  ;;  %1422 = vmatmul.mubr.f32.gmra.mrb[44].mxu1 %v435_v57  ;;  %v339_v56 = vld [vmem:[%s2595_s8 + $0x260] sm:$0xff] }
  0x87   : > { %2312 = vmatprep.mubr.msk.f32.mxu0 %vm538_vm0, %v310_v58  ;;  %2376 = vmatprep.mubr.msk.f32.mxu1 %vm538_vm0, %v438_v59  ;;  %v467_v57 = vld [vmem:[%s2595_s8 + $0x660] sm:$0xff]  ;;  %v342_v58 = vld [vmem:[%s2595_s8 + $0x278] sm:$0xff] }
  0x88   : > { %v470_v59 = vld [vmem:[%s2595_s8 + $0x678] sm:$0xff] }
  0x8a   : > { %1107 = vmatmul.mubr.f32.gmra.mrb[46].mxu0 %v309_v60  ;;  %1427 = vmatmul.mubr.f32.gmra.mrb[46].mxu1 %v437_v61  ;;  %v341_v60 = vld [vmem:[%s2595_s8 + $0x270] sm:$0xff] }
  0x8b   : > { %2313 = vmatprep.mubr.msk.f32.mxu0 %vm538_vm0, %v312_v62  ;;  %2377 = vmatprep.mubr.msk.f32.mxu1 %vm538_vm0, %v440_v63  ;;  %v469_v61 = vld [vmem:[%s2595_s8 + $0x670] sm:$0xff]  ;;  %v344_v62 = vld [vmem:[%s2595_s8 + $0x288] sm:$0xff] }
  0x8c   : > { %v472_v63 = vld [vmem:[%s2595_s8 + $0x688] sm:$0xff] }
  0x8e   : > { %1112 = vmatmul.mubr.f32.gmra.mrb[48].mxu0 %v311_v0  ;;  %1432 = vmatmul.mubr.f32.gmra.mrb[48].mxu1 %v439_v1  ;;  %v343_v0 = vld [vmem:[%s2595_s8 + $0x280] sm:$0xff] }
  0x8f   : > { %2314 = vmatprep.mubr.msk.f32.mxu0 %vm538_vm0, %v314_v2  ;;  %2378 = vmatprep.mubr.msk.f32.mxu1 %vm538_vm0, %v442_v3  ;;  %v471_v1 = vld [vmem:[%s2595_s8 + $0x680] sm:$0xff]  ;;  %v346_v2 = vld [vmem:[%s2595_s8 + $0x298] sm:$0xff] }
  0x90   : > { %v474_v3 = vld [vmem:[%s2595_s8 + $0x698] sm:$0xff] }
  0x92   : > { %1117 = vmatmul.mubr.f32.gmra.mrb[50].mxu0 %v313_v4  ;;  %1437 = vmatmul.mubr.f32.gmra.mrb[50].mxu1 %v441_v5  ;;  %v345_v4 = vld [vmem:[%s2595_s8 + $0x290] sm:$0xff] }
  0x93   : > { %2315 = vmatprep.mubr.msk.f32.mxu0 %vm538_vm0, %v316_v6  ;;  %2379 = vmatprep.mubr.msk.f32.mxu1 %vm538_vm0, %v444_v7  ;;  %v473_v5 = vld [vmem:[%s2595_s8 + $0x690] sm:$0xff]  ;;  %v348_v6 = vld [vmem:[%s2595_s8 + $0x2a8] sm:$0xff] }
  0x94   : > { %v476_v7 = vld [vmem:[%s2595_s8 + $0x6a8] sm:$0xff] }
  0x96   : > { %1122 = vmatmul.mubr.f32.gmra.mrb[52].mxu0 %v315_v8  ;;  %1442 = vmatmul.mubr.f32.gmra.mrb[52].mxu1 %v443_v9  ;;  %v347_v8 = vld [vmem:[%s2595_s8 + $0x2a0] sm:$0xff] }
  0x97   : > { %2316 = vmatprep.mubr.msk.f32.mxu0 %vm538_vm0, %v318_v10  ;;  %2380 = vmatprep.mubr.msk.f32.mxu1 %vm538_vm0, %v446_v11  ;;  %v475_v9 = vld [vmem:[%s2595_s8 + $0x6a0] sm:$0xff]  ;;  %v350_v10 = vld [vmem:[%s2595_s8 + $0x2b8] sm:$0xff] }
  0x98   : > { %v478_v11 = vld [vmem:[%s2595_s8 + $0x6b8] sm:$0xff] }
  0x9a   : > { %1127 = vmatmul.mubr.f32.gmra.mrb[54].mxu0 %v317_v12  ;;  %1447 = vmatmul.mubr.f32.gmra.mrb[54].mxu1 %v445_v13  ;;  %v349_v12 = vld [vmem:[%s2595_s8 + $0x2b0] sm:$0xff] }
  0x9b   : > { %2317 = vmatprep.mubr.msk.f32.mxu0 %vm538_vm0, %v320_v14  ;;  %2381 = vmatprep.mubr.msk.f32.mxu1 %vm538_vm0, %v448_v15  ;;  %v477_v13 = vld [vmem:[%s2595_s8 + $0x6b0] sm:$0xff]  ;;  %v352_v14 = vld [vmem:[%s2595_s8 + $0x2c8] sm:$0xff] }
  0x9c   : > { %v480_v15 = vld [vmem:[%s2595_s8 + $0x6c8] sm:$0xff] }
  0x9e   : > { %1132 = vmatmul.mubr.f32.gmra.mrb[56].mxu0 %v319_v16  ;;  %1452 = vmatmul.mubr.f32.gmra.mrb[56].mxu1 %v447_v17  ;;  %v351_v16 = vld [vmem:[%s2595_s8 + $0x2c0] sm:$0xff] }
  0x9f   : > { %2318 = vmatprep.mubr.msk.f32.mxu0 %vm538_vm0, %v322_v18  ;;  %2382 = vmatprep.mubr.msk.f32.mxu1 %vm538_vm0, %v450_v19  ;;  %v479_v17 = vld [vmem:[%s2595_s8 + $0x6c0] sm:$0xff]  ;;  %v354_v18 = vld [vmem:[%s2595_s8 + $0x2d8] sm:$0xff] }
  0xa0   : > { %v482_v19 = vld [vmem:[%s2595_s8 + $0x6d8] sm:$0xff] }
  0xa2   : > { %1137 = vmatmul.mubr.f32.gmra.mrb[58].mxu0 %v321_v20  ;;  %1457 = vmatmul.mubr.f32.gmra.mrb[58].mxu1 %v449_v21  ;;  %v353_v20 = vld [vmem:[%s2595_s8 + $0x2d0] sm:$0xff] }
  0xa3   : > { %2319 = vmatprep.mubr.msk.f32.mxu0 %vm538_vm0, %v324_v22  ;;  %2383 = vmatprep.mubr.msk.f32.mxu1 %vm538_vm0, %v452_v23  ;;  %v481_v21 = vld [vmem:[%s2595_s8 + $0x6d0] sm:$0xff]  ;;  %v356_v22 = vld [vmem:[%s2595_s8 + $0x2e8] sm:$0xff] }
  0xa4   : > { %v484_v23 = vld [vmem:[%s2595_s8 + $0x6e8] sm:$0xff] }
  0xa6   : > { %1142 = vmatmul.mubr.f32.gmra.mrb[60].mxu0 %v323_v24  ;;  %1462 = vmatmul.mubr.f32.gmra.mrb[60].mxu1 %v451_v25  ;;  %v355_v24 = vld [vmem:[%s2595_s8 + $0x2e0] sm:$0xff] }
  0xa7   : > { %2320 = vmatprep.mubr.msk.f32.mxu0 %vm538_vm0, %v326_v26  ;;  %2384 = vmatprep.mubr.msk.f32.mxu1 %vm538_vm0, %v454_v27  ;;  %v483_v25 = vld [vmem:[%s2595_s8 + $0x6e0] sm:$0xff]  ;;  %v358_v26 = vld [vmem:[%s2595_s8 + $0x2f8] sm:$0xff] }
  0xa8   : > { %v486_v27 = vld [vmem:[%s2595_s8 + $0x6f8] sm:$0xff] }
  0xaa   : > { %1147 = vmatmul.mubr.f32.gmra.mrb[62].mxu0 %v325_v28  ;;  %1467 = vmatmul.mubr.f32.gmra.mrb[62].mxu1 %v453_v29  ;;  %v357_v28 = vld [vmem:[%s2595_s8 + $0x2f0] sm:$0xff] }
  0xab   : > { %2321 = vmatprep.mubr.msk.f32.mxu0 %vm538_vm0, %v328_v30  ;;  %2385 = vmatprep.mubr.msk.f32.mxu1 %vm538_vm0, %v456_v31  ;;  %v485_v29 = vld [vmem:[%s2595_s8 + $0x6f0] sm:$0xff]  ;;  %v360_v30 = vld [vmem:[%s2595_s8 + $0x308] sm:$0xff] }
  0xac   : > { %v488_v31 = vld [vmem:[%s2595_s8 + $0x708] sm:$0xff] }
  0xae   : > { %1152 = vmatmul.mubr.f32.gmra.mrb[64].mxu0 %v327_v32  ;;  %1472 = vmatmul.mubr.f32.gmra.mrb[64].mxu1 %v455_v33  ;;  %v359_v32 = vld [vmem:[%s2595_s8 + $0x300] sm:$0xff] }
  0xaf   : > { %2322 = vmatprep.mubr.msk.f32.mxu0 %vm538_vm0, %v330_v34  ;;  %2386 = vmatprep.mubr.msk.f32.mxu1 %vm538_vm0, %v458_v35  ;;  %v487_v33 = vld [vmem:[%s2595_s8 + $0x700] sm:$0xff]  ;;  %v362_v34 = vld [vmem:[%s2595_s8 + $0x318] sm:$0xff] }
  0xb0   : > { %v490_v35 = vld [vmem:[%s2595_s8 + $0x718] sm:$0xff] }
  0xb2   : > { %1157 = vmatmul.mubr.f32.gmra.mrb[66].mxu0 %v329_v36  ;;  %1477 = vmatmul.mubr.f32.gmra.mrb[66].mxu1 %v457_v37  ;;  %v361_v36 = vld [vmem:[%s2595_s8 + $0x310] sm:$0xff] }
  0xb3   : > { %2323 = vmatprep.mubr.msk.f32.mxu0 %vm538_vm0, %v332_v38  ;;  %2387 = vmatprep.mubr.msk.f32.mxu1 %vm538_vm0, %v460_v39  ;;  %v489_v37 = vld [vmem:[%s2595_s8 + $0x710] sm:$0xff]  ;;  %v364_v38 = vld [vmem:[%s2595_s8 + $0x328] sm:$0xff] }
  0xb4   : > { %v492_v39 = vld [vmem:[%s2595_s8 + $0x728] sm:$0xff] }
  0xb6   : > { %1162 = vmatmul.mubr.f32.gmra.mrb[68].mxu0 %v331_v40  ;;  %1482 = vmatmul.mubr.f32.gmra.mrb[68].mxu1 %v459_v41  ;;  %v363_v40 = vld [vmem:[%s2595_s8 + $0x320] sm:$0xff] }
  0xb7   : > { %2324 = vmatprep.mubr.msk.f32.mxu0 %vm538_vm0, %v334_v42  ;;  %2388 = vmatprep.mubr.msk.f32.mxu1 %vm538_vm0, %v462_v43  ;;  %v491_v41 = vld [vmem:[%s2595_s8 + $0x720] sm:$0xff]  ;;  %v366_v42 = vld [vmem:[%s2595_s8 + $0x338] sm:$0xff] }
  0xb8   : > { %v494_v43 = vld [vmem:[%s2595_s8 + $0x738] sm:$0xff] }
  0xba   : > { %1167 = vmatmul.mubr.f32.gmra.mrb[70].mxu0 %v333_v44  ;;  %1487 = vmatmul.mubr.f32.gmra.mrb[70].mxu1 %v461_v45  ;;  %v365_v44 = vld [vmem:[%s2595_s8 + $0x330] sm:$0xff] }
  0xbb   : > { %2325 = vmatprep.mubr.msk.f32.mxu0 %vm538_vm0, %v336_v46  ;;  %2389 = vmatprep.mubr.msk.f32.mxu1 %vm538_vm0, %v464_v47  ;;  %v493_v45 = vld [vmem:[%s2595_s8 + $0x730] sm:$0xff]  ;;  %v368_v46 = vld [vmem:[%s2595_s8 + $0x348] sm:$0xff] }
  0xbc   : > { %v496_v47 = vld [vmem:[%s2595_s8 + $0x748] sm:$0xff] }
  0xbe   : > { %1172 = vmatmul.mubr.f32.gmra.mrb[72].mxu0 %v335_v48  ;;  %1492 = vmatmul.mubr.f32.gmra.mrb[72].mxu1 %v463_v49  ;;  %v367_v48 = vld [vmem:[%s2595_s8 + $0x340] sm:$0xff] }
  0xbf   : > { %2326 = vmatprep.mubr.msk.f32.mxu0 %vm538_vm0, %v338_v50  ;;  %2390 = vmatprep.mubr.msk.f32.mxu1 %vm538_vm0, %v466_v51  ;;  %v495_v49 = vld [vmem:[%s2595_s8 + $0x740] sm:$0xff]  ;;  %v370_v50 = vld [vmem:[%s2595_s8 + $0x358] sm:$0xff] }
  0xc0   : > { %v498_v51 = vld [vmem:[%s2595_s8 + $0x758] sm:$0xff] }
  0xc2   : > { %1177 = vmatmul.mubr.f32.gmra.mrb[74].mxu0 %v337_v52  ;;  %1497 = vmatmul.mubr.f32.gmra.mrb[74].mxu1 %v465_v53  ;;  %v2973_v52 = vld [vmem:[%s3583_s2] ss:$0 sm:$0xff]  ;;  %v369_v53 = vld [vmem:[%s2595_s8 + $0x350] sm:$0xff] }
  0xc3   : > { %2327 = vmatprep.mubr.msk.f32.mxu0 %vm538_vm0, %v340_v54  ;;  %2391 = vmatprep.mubr.msk.f32.mxu1 %vm538_vm0, %v468_v55  ;;  %v497_v54 = vld [vmem:[%s2595_s8 + $0x750] sm:$0xff]  ;;  %v372_v55 = vld [vmem:[%s2595_s8 + $0x368] sm:$0xff] }
  0xc6   : > { %1182 = vmatmul.mubr.f32.gmra.mrb[76].mxu0 %v339_v56  ;;  %1502 = vmatmul.mubr.f32.gmra.mrb[76].mxu1 %v467_v57  ;;  %v500_v56 = vld [vmem:[%s2595_s8 + $0x768] sm:$0xff] }
  0xc7   : > { %2328 = vmatprep.mubr.msk.f32.mxu0 %vm538_vm0, %v342_v58  ;;  %2392 = vmatprep.mubr.msk.f32.mxu1 %vm538_vm0, %v470_v59  ;;  %v2984_v58 = vld [vmem:[%s3584_s3] ss:$0 sm:$0xff] }
  0xca   : > { %1187 = vmatmul.mubr.f32.gmra.mrb[78].mxu0 %v341_v60  ;;  %1507 = vmatmul.mubr.f32.gmra.mrb[78].mxu1 %v469_v61 }
  0xcb   : > { %2329 = vmatprep.mubr.msk.f32.mxu0 %vm538_vm0, %v344_v62  ;;  %2393 = vmatprep.mubr.msk.f32.mxu1 %vm538_vm0, %v472_v63 }
  0xce   : > { %1192 = vmatmul.mubr.f32.gmra.mrb[80].mxu0 %v343_v0  ;;  %1512 = vmatmul.mubr.f32.gmra.mrb[80].mxu1 %v471_v1  ;;  %v371_v0 = vld [vmem:[%s2595_s8 + $0x360] sm:$0xff] }
  0xcf   : > { %2330 = vmatprep.mubr.msk.f32.mxu0 %vm538_vm0, %v346_v2  ;;  %2394 = vmatprep.mubr.msk.f32.mxu1 %vm538_vm0, %v474_v3  ;;  %v499_v1 = vld [vmem:[%s2595_s8 + $0x760] sm:$0xff] }
  0xd2   : > { %1197 = vmatmul.mubr.f32.gmra.mrb[82].mxu0 %v345_v4  ;;  %1517 = vmatmul.mubr.f32.gmra.mrb[82].mxu1 %v473_v5  ;;  %v374_v4 = vld [vmem:[%s2595_s8 + $0x378] sm:$0xff] }
  0xd3   : > { %2331 = vmatprep.mubr.msk.f32.mxu0 %vm538_vm0, %v348_v6  ;;  %2395 = vmatprep.mubr.msk.f32.mxu1 %vm538_vm0, %v476_v7  ;;  %v502_v5 = vld [vmem:[%s2595_s8 + $0x778] sm:$0xff] }
  0xd6   : > { %1202 = vmatmul.mubr.f32.gmra.mrb[84].mxu0 %v347_v8  ;;  %1522 = vmatmul.mubr.f32.gmra.mrb[84].mxu1 %v475_v9 }
  0xd7   : > { %2332 = vmatprep.mubr.msk.f32.mxu0 %vm538_vm0, %v350_v10  ;;  %2396 = vmatprep.mubr.msk.f32.mxu1 %vm538_vm0, %v478_v11 }
  0xda   : > { %1207 = vmatmul.mubr.f32.gmra.mrb[86].mxu0 %v349_v12  ;;  %1527 = vmatmul.mubr.f32.gmra.mrb[86].mxu1 %v477_v13 }
  0xdb   : > { %2333 = vmatprep.mubr.msk.f32.mxu0 %vm538_vm0, %v352_v14  ;;  %2397 = vmatprep.mubr.msk.f32.mxu1 %vm538_vm0, %v480_v15  ;;  %v373_v14 = vld [vmem:[%s2595_s8 + $0x370] sm:$0xff] }
  0xdc   : > { %v501_v15 = vld [vmem:[%s2595_s8 + $0x770] sm:$0xff] }
  0xde   : > { %1212 = vmatmul.mubr.f32.gmra.mrb[88].mxu0 %v351_v16  ;;  %1532 = vmatmul.mubr.f32.gmra.mrb[88].mxu1 %v479_v17 }
  0xdf   : > { %2334 = vmatprep.mubr.msk.f32.mxu0 %vm538_vm0, %v354_v18  ;;  %2398 = vmatprep.mubr.msk.f32.mxu1 %vm538_vm0, %v482_v19  ;;  %v376_v18 = vld [vmem:[%s2595_s8 + $0x388] sm:$0xff] }
  0xe0   : > { %v504_v19 = vld [vmem:[%s2595_s8 + $0x788] sm:$0xff] }
  0xe2   : > { %1217 = vmatmul.mubr.f32.gmra.mrb[90].mxu0 %v353_v20  ;;  %1537 = vmatmul.mubr.f32.gmra.mrb[90].mxu1 %v481_v21 }
  0xe3   : > { %2335 = vmatprep.mubr.msk.f32.mxu0 %vm538_vm0, %v356_v22  ;;  %2399 = vmatprep.mubr.msk.f32.mxu1 %vm538_vm0, %v484_v23 }
  0xe6   : > { %1222 = vmatmul.mubr.f32.gmra.mrb[92].mxu0 %v355_v24  ;;  %1542 = vmatmul.mubr.f32.gmra.mrb[92].mxu1 %v483_v25 }
  0xe7   : > { %2336 = vmatprep.mubr.msk.f32.mxu0 %vm538_vm0, %v358_v26  ;;  %2400 = vmatprep.mubr.msk.f32.mxu1 %vm538_vm0, %v486_v27 }
  0xea   : > { %1227 = vmatmul.mubr.f32.gmra.mrb[94].mxu0 %v357_v28  ;;  %1547 = vmatmul.mubr.f32.gmra.mrb[94].mxu1 %v485_v29  ;;  %v375_v28 = vld [vmem:[%s2595_s8 + $0x380] sm:$0xff] }
  0xeb   : > { %2337 = vmatprep.mubr.msk.f32.mxu0 %vm538_vm0, %v360_v30  ;;  %2401 = vmatprep.mubr.msk.f32.mxu1 %vm538_vm0, %v488_v31  ;;  %v503_v29 = vld [vmem:[%s2595_s8 + $0x780] sm:$0xff] }
  0xee   : > { %1232 = vmatmul.mubr.f32.gmra.mrb[96].mxu0 %v359_v32  ;;  %1552 = vmatmul.mubr.f32.gmra.mrb[96].mxu1 %v487_v33  ;;  %v378_v32 = vld [vmem:[%s2595_s8 + $0x398] sm:$0xff] }
  0xef   : > { %2338 = vmatprep.mubr.msk.f32.mxu0 %vm538_vm0, %v362_v34  ;;  %2402 = vmatprep.mubr.msk.f32.mxu1 %vm538_vm0, %v490_v35  ;;  %v506_v33 = vld [vmem:[%s2595_s8 + $0x798] sm:$0xff] }
  0xf2   : > { %1237 = vmatmul.mubr.f32.gmra.mrb[98].mxu0 %v361_v36  ;;  %1557 = vmatmul.mubr.f32.gmra.mrb[98].mxu1 %v489_v37 }
  0xf3   : > { %2339 = vmatprep.mubr.msk.f32.mxu0 %vm538_vm0, %v364_v38  ;;  %2403 = vmatprep.mubr.msk.f32.mxu1 %vm538_vm0, %v492_v39 }
  0xf6   : > { %1242 = vmatmul.mubr.f32.gmra.mrb[100].mxu0 %v363_v40  ;;  %1562 = vmatmul.mubr.f32.gmra.mrb[100].mxu1 %v491_v41 }
  0xf7   : > { %2340 = vmatprep.mubr.msk.f32.mxu0 %vm538_vm0, %v366_v42  ;;  %2404 = vmatprep.mubr.msk.f32.mxu1 %vm538_vm0, %v494_v43  ;;  %v377_v42 = vld [vmem:[%s2595_s8 + $0x390] sm:$0xff] }
  0xf8   : > { %v505_v43 = vld [vmem:[%s2595_s8 + $0x790] sm:$0xff] }
  0xfa   : > { %1247 = vmatmul.mubr.f32.gmra.mrb[102].mxu0 %v365_v44  ;;  %1567 = vmatmul.mubr.f32.gmra.mrb[102].mxu1 %v493_v45 }
  0xfb   : > { %2341 = vmatprep.mubr.msk.f32.mxu0 %vm538_vm0, %v368_v46  ;;  %2405 = vmatprep.mubr.msk.f32.mxu1 %vm538_vm0, %v496_v47  ;;  %v380_v46 = vld [vmem:[%s2595_s8 + $0x3a8] sm:$0xff] }
  0xfc   : > { %v508_v47 = vld [vmem:[%s2595_s8 + $0x7a8] sm:$0xff] }
  0xfe   : > { %1252 = vmatmul.mubr.f32.gmra.mrb[104].mxu0 %v367_v48  ;;  %1572 = vmatmul.mubr.f32.gmra.mrb[104].mxu1 %v495_v49 }
  0xff   : > { %2342 = vmatprep.mubr.msk.f32.mxu0 %vm538_vm0, %v370_v50  ;;  %2406 = vmatprep.mubr.msk.f32.mxu1 %vm538_vm0, %v498_v51 }
 0x101   : > { %v993_v57 = vpop.f32.mrb[0].mxu0  ;;  %v1313_v59 = vpop.f32.mrb[0].mxu1 }
 0x102   : > { %v1639_v60 = vmul.f32 %v2973_v52, %v993_v57  ;;  %v1703_v61 = vmul.f32 %v2973_v52, %v1313_v59  ;;  %v995_v62 = vpop.f32.mrb[1].mxu0  ;;  %1257 = vmatmul.mubr.f32.gmra.mrb[106].mxu0 %v369_v53  ;;  %v1315_v63 = vpop.f32.mrb[1].mxu1  ;;  %1577 = vmatmul.mubr.f32.gmra.mrb[106].mxu1 %v497_v54  ;;  %v379_v57 = vld [vmem:[%s2595_s8 + $0x3a0] sm:$0xff] }
 0x103   : > { %2343 = vmatprep.mubr.msk.f32.mxu0 %vm538_vm0, %v372_v55  ;;  %2407 = vmatprep.mubr.msk.f32.mxu1 %vm538_vm0, %v500_v56  ;;  %v507_v59 = vld [vmem:[%s2595_s8 + $0x7a0] sm:$0xff]  ;;  %v382_v62 = vld [vmem:[%s2595_s8 + $0x3b8] sm:$0xff] }
 0x104   : > { %v1774_v2 = vadd.f32 %v2984_v58, %v1639_v60  ;;  %v1838_v3 = vadd.f32 %v2984_v58, %v1703_v61  ;;  %v510_v63 = vld [vmem:[%s2595_s8 + $0x7b8] sm:$0xff] }
 0x105   : > { %v998_v6 = vpop.f32.mrb[2].mxu0  ;;  %v1318_v7 = vpop.f32.mrb[2].mxu1 }
 0x106   : > { %v1902_v8 = vmax.f32 %v1774_v2, 0.0  ;;  %v1966_v9 = vmax.f32 %v1838_v3, 0.0  ;;  %v1640_v10 = vmul.f32 %v2973_v52, %v998_v6  ;;  %v1704_v11 = vmul.f32 %v2973_v52, %v1318_v7  ;;  %v1000_v12 = vpop.f32.mrb[3].mxu0  ;;  %1262 = vmatmul.mubr.f32.gmra.mrb[108].mxu0 %v371_v0  ;;  %v1320_v13 = vpop.f32.mrb[3].mxu1  ;;  %1582 = vmatmul.mubr.f32.gmra.mrb[108].mxu1 %v499_v1 }
 0x107   : > { %2344 = vmatprep.mubr.msk.f32.mxu0 %vm538_vm0, %v374_v4  ;;  %2408 = vmatprep.mubr.msk.f32.mxu1 %vm538_vm0, %v502_v5  ;;  %v384_v12 = vld [vmem:[%s2595_s8 + $0x3c8] sm:$0xff] }
 0x108   : > { %2031 = vst.msk [vmem:[%s3000_s24] sm:$0xff] %vm2030_vm2, %v1902_v8  ;;  %2095 = vst.msk [vmem:[%s3000_s24 + $0x200] sm:$0xff] %vm2030_vm2, %v1966_v9  ;;  %v1775_v16 = vadd.f32 %v2984_v58, %v1640_v10  ;;  %v1839_v17 = vadd.f32 %v2984_v58, %v1704_v11  ;;  %v381_v8 = vld [vmem:[%s2595_s8 + $0x3b0] sm:$0xff]  ;;  %v512_v13 = vld [vmem:[%s2595_s8 + $0x7c8] sm:$0xff] }
 0x109   : > { %v1003_v20 = vpop.f32.mrb[4].mxu0  ;;  %v1323_v21 = vpop.f32.mrb[4].mxu1  ;;  %v509_v9 = vld [vmem:[%s2595_s8 + $0x7b0] sm:$0xff] }
 0x10a   : > { %v1903_v22 = vmax.f32 %v1775_v16, 0.0  ;;  %v1967_v23 = vmax.f32 %v1839_v17, 0.0  ;;  %v1641_v24 = vmul.f32 %v2973_v52, %v1003_v20  ;;  %v1705_v25 = vmul.f32 %v2973_v52, %v1323_v21  ;;  %v1005_v26 = vpop.f32.mrb[5].mxu0  ;;  %1267 = vmatmul.mubr.f32.gmra.mrb[110].mxu0 %v373_v14  ;;  %v1325_v27 = vpop.f32.mrb[5].mxu1  ;;  %1587 = vmatmul.mubr.f32.gmra.mrb[110].mxu1 %v501_v15 }
 0x10b   : > { %2345 = vmatprep.mubr.msk.f32.mxu0 %vm538_vm0, %v376_v18  ;;  %2409 = vmatprep.mubr.msk.f32.mxu1 %vm538_vm0, %v504_v19  ;;  %v386_v26 = vld [vmem:[%s2595_s8 + $0x3d8] sm:$0xff] }
 0x10c   : > { %2032 = vst.msk [vmem:[%s3000_s24 + $0x8] sm:$0xff] %vm2030_vm2, %v1903_v22  ;;  %2096 = vst.msk [vmem:[%s3000_s24 + $0x208] sm:$0xff] %vm2030_vm2, %v1967_v23  ;;  %v1776_v30 = vadd.f32 %v2984_v58, %v1641_v24  ;;  %v1840_v31 = vadd.f32 %v2984_v58, %v1705_v25  ;;  %v383_v22 = vld [vmem:[%s2595_s8 + $0x3c0] sm:$0xff]  ;;  %v514_v27 = vld [vmem:[%s2595_s8 + $0x7d8] sm:$0xff] }
 0x10d   : > { %v1008_v34 = vpop.f32.mrb[6].mxu0  ;;  %v1328_v35 = vpop.f32.mrb[6].mxu1  ;;  %v511_v23 = vld [vmem:[%s2595_s8 + $0x7c0] sm:$0xff] }
 0x10e   : > { %v1904_v36 = vmax.f32 %v1776_v30, 0.0  ;;  %v1968_v37 = vmax.f32 %v1840_v31, 0.0  ;;  %v1642_v38 = vmul.f32 %v2973_v52, %v1008_v34  ;;  %v1706_v39 = vmul.f32 %v2973_v52, %v1328_v35  ;;  %v1010_v40 = vpop.f32.mrb[7].mxu0  ;;  %1272 = vmatmul.mubr.f32.gmra.mrb[112].mxu0 %v375_v28  ;;  %v1330_v41 = vpop.f32.mrb[7].mxu1  ;;  %1592 = vmatmul.mubr.f32.gmra.mrb[112].mxu1 %v503_v29 }
 0x10f   : > { %2346 = vmatprep.mubr.msk.f32.mxu0 %vm538_vm0, %v378_v32  ;;  %2410 = vmatprep.mubr.msk.f32.mxu1 %vm538_vm0, %v506_v33  ;;  %v388_v40 = vld [vmem:[%s2595_s8 + $0x3e8] sm:$0xff] }
 0x110   : > { %2033 = vst.msk [vmem:[%s3000_s24 + $0x10] sm:$0xff] %vm2030_vm2, %v1904_v36  ;;  %2097 = vst.msk [vmem:[%s3000_s24 + $0x210] sm:$0xff] %vm2030_vm2, %v1968_v37  ;;  %v1777_v44 = vadd.f32 %v2984_v58, %v1642_v38  ;;  %v1841_v45 = vadd.f32 %v2984_v58, %v1706_v39  ;;  %v385_v36 = vld [vmem:[%s2595_s8 + $0x3d0] sm:$0xff]  ;;  %v516_v41 = vld [vmem:[%s2595_s8 + $0x7e8] sm:$0xff] }
 0x111   : > { %v1013_v48 = vpop.f32.mrb[8].mxu0  ;;  %v1333_v49 = vpop.f32.mrb[8].mxu1  ;;  %v513_v37 = vld [vmem:[%s2595_s8 + $0x7d0] sm:$0xff] }
 0x112   : > { %v1905_v50 = vmax.f32 %v1777_v44, 0.0  ;;  %v1969_v51 = vmax.f32 %v1841_v45, 0.0  ;;  %v1643_v53 = vmul.f32 %v2973_v52, %v1013_v48  ;;  %v1707_v54 = vmul.f32 %v2973_v52, %v1333_v49  ;;  %v1015_v55 = vpop.f32.mrb[9].mxu0  ;;  %1277 = vmatmul.mubr.f32.gmra.mrb[114].mxu0 %v377_v42  ;;  %v1335_v56 = vpop.f32.mrb[9].mxu1  ;;  %1597 = vmatmul.mubr.f32.gmra.mrb[114].mxu1 %v505_v43 }
 0x113   : > { %2347 = vmatprep.mubr.msk.f32.mxu0 %vm538_vm0, %v380_v46  ;;  %2411 = vmatprep.mubr.msk.f32.mxu1 %vm538_vm0, %v508_v47  ;;  %v390_v55 = vld [vmem:[%s2595_s8 + $0x3f8] sm:$0xff] }
 0x114   : > { %2034 = vst.msk [vmem:[%s3000_s24 + $0x18] sm:$0xff] %vm2030_vm2, %v1905_v50  ;;  %2098 = vst.msk [vmem:[%s3000_s24 + $0x218] sm:$0xff] %vm2030_vm2, %v1969_v51  ;;  %v1778_v60 = vadd.f32 %v2984_v58, %v1643_v53  ;;  %v1842_v61 = vadd.f32 %v2984_v58, %v1707_v54  ;;  %v387_v50 = vld [vmem:[%s2595_s8 + $0x3e0] sm:$0xff]  ;;  %v518_v56 = vld [vmem:[%s2595_s8 + $0x7f8] sm:$0xff] }
 0x115   : > { %v1018_v0 = vpop.f32.mrb[10].mxu0  ;;  %v1338_v1 = vpop.f32.mrb[10].mxu1  ;;  %v515_v51 = vld [vmem:[%s2595_s8 + $0x7e0] sm:$0xff] }
 0x116   : > { %v1906_v2 = vmax.f32 %v1778_v60, 0.0  ;;  %v1970_v3 = vmax.f32 %v1842_v61, 0.0  ;;  %v1644_v4 = vmul.f32 %v2973_v52, %v1018_v0  ;;  %v1708_v5 = vmul.f32 %v2973_v52, %v1338_v1  ;;  %v1020_v6 = vpop.f32.mrb[11].mxu0  ;;  %1282 = vmatmul.mubr.f32.gmra.mrb[116].mxu0 %v379_v57  ;;  %v1340_v7 = vpop.f32.mrb[11].mxu1  ;;  %1602 = vmatmul.mubr.f32.gmra.mrb[116].mxu1 %v507_v59 }
 0x117   : > { %2348 = vmatprep.mubr.msk.f32.mxu0 %vm538_vm0, %v382_v62  ;;  %2412 = vmatprep.mubr.msk.f32.mxu1 %vm538_vm0, %v510_v63 }
 0x118   : > { %2035 = vst.msk [vmem:[%s3000_s24 + $0x20] sm:$0xff] %vm2030_vm2, %v1906_v2  ;;  %2099 = vst.msk [vmem:[%s3000_s24 + $0x220] sm:$0xff] %vm2030_vm2, %v1970_v3  ;;  %v1779_v10 = vadd.f32 %v2984_v58, %v1644_v4  ;;  %v1843_v11 = vadd.f32 %v2984_v58, %v1708_v5  ;;  %v389_v2 = vld [vmem:[%s2595_s8 + $0x3f0] sm:$0xff] }
 0x119   : > { %v1023_v14 = vpop.f32.mrb[12].mxu0  ;;  %v1343_v15 = vpop.f32.mrb[12].mxu1  ;;  %v517_v3 = vld [vmem:[%s2595_s8 + $0x7f0] sm:$0xff] }
 0x11a   : > { %v1907_v16 = vmax.f32 %v1779_v10, 0.0  ;;  %v1971_v17 = vmax.f32 %v1843_v11, 0.0  ;;  %v1645_v18 = vmul.f32 %v2973_v52, %v1023_v14  ;;  %v1709_v19 = vmul.f32 %v2973_v52, %v1343_v15  ;;  %v1025_v20 = vpop.f32.mrb[13].mxu0  ;;  %1287 = vmatmul.mubr.f32.gmra.mrb[118].mxu0 %v381_v8  ;;  %v1345_v21 = vpop.f32.mrb[13].mxu1  ;;  %1607 = vmatmul.mubr.f32.gmra.mrb[118].mxu1 %v509_v9 }
 0x11b   : > { %2349 = vmatprep.mubr.msk.f32.mxu0 %vm538_vm0, %v384_v12  ;;  %2413 = vmatprep.mubr.msk.f32.mxu1 %vm538_vm0, %v512_v13 }
 0x11c   : > { %2036 = vst.msk [vmem:[%s3000_s24 + $0x28] sm:$0xff] %vm2030_vm2, %v1907_v16  ;;  %2100 = vst.msk [vmem:[%s3000_s24 + $0x228] sm:$0xff] %vm2030_vm2, %v1971_v17  ;;  %v1780_v24 = vadd.f32 %v2984_v58, %v1645_v18  ;;  %v1844_v25 = vadd.f32 %v2984_v58, %v1709_v19 }
 0x11d   : > { %v1028_v28 = vpop.f32.mrb[14].mxu0  ;;  %v1348_v29 = vpop.f32.mrb[14].mxu1 }
 0x11e   : > { %v1908_v30 = vmax.f32 %v1780_v24, 0.0  ;;  %v1972_v31 = vmax.f32 %v1844_v25, 0.0  ;;  %v1646_v32 = vmul.f32 %v2973_v52, %v1028_v28  ;;  %v1710_v33 = vmul.f32 %v2973_v52, %v1348_v29  ;;  %v1030_v34 = vpop.f32.mrb[15].mxu0  ;;  %1292 = vmatmul.mubr.f32.gmra.mrb[120].mxu0 %v383_v22  ;;  %v1350_v35 = vpop.f32.mrb[15].mxu1  ;;  %1612 = vmatmul.mubr.f32.gmra.mrb[120].mxu1 %v511_v23 }
 0x11f   : > { %2350 = vmatprep.mubr.msk.f32.mxu0 %vm538_vm0, %v386_v26  ;;  %2414 = vmatprep.mubr.msk.f32.mxu1 %vm538_vm0, %v514_v27 }
 0x120   : > { %2037 = vst.msk [vmem:[%s3000_s24 + $0x30] sm:$0xff] %vm2030_vm2, %v1908_v30  ;;  %2101 = vst.msk [vmem:[%s3000_s24 + $0x230] sm:$0xff] %vm2030_vm2, %v1972_v31  ;;  %v1781_v38 = vadd.f32 %v2984_v58, %v1646_v32  ;;  %v1845_v39 = vadd.f32 %v2984_v58, %v1710_v33 }
 0x121   : > { %v1033_v42 = vpop.f32.mrb[16].mxu0  ;;  %v1353_v43 = vpop.f32.mrb[16].mxu1 }
 0x122   : > { %v1909_v44 = vmax.f32 %v1781_v38, 0.0  ;;  %v1973_v45 = vmax.f32 %v1845_v39, 0.0  ;;  %v1647_v46 = vmul.f32 %v2973_v52, %v1033_v42  ;;  %v1711_v47 = vmul.f32 %v2973_v52, %v1353_v43  ;;  %v1035_v48 = vpop.f32.mrb[17].mxu0  ;;  %1297 = vmatmul.mubr.f32.gmra.mrb[122].mxu0 %v385_v36  ;;  %v1355_v49 = vpop.f32.mrb[17].mxu1  ;;  %1617 = vmatmul.mubr.f32.gmra.mrb[122].mxu1 %v513_v37 }
 0x123   : > { %2351 = vmatprep.mubr.msk.f32.mxu0 %vm538_vm0, %v388_v40  ;;  %2415 = vmatprep.mubr.msk.f32.mxu1 %vm538_vm0, %v516_v41 }
 0x124   : > { %2038 = vst.msk [vmem:[%s3000_s24 + $0x38] sm:$0xff] %vm2030_vm2, %v1909_v44  ;;  %2102 = vst.msk [vmem:[%s3000_s24 + $0x238] sm:$0xff] %vm2030_vm2, %v1973_v45  ;;  %v1782_v53 = vadd.f32 %v2984_v58, %v1647_v46  ;;  %v1846_v54 = vadd.f32 %v2984_v58, %v1711_v47 }
 0x125   : > { %v1038_v57 = vpop.f32.mrb[18].mxu0  ;;  %v1358_v59 = vpop.f32.mrb[18].mxu1 }
 0x126   : > { %v1910_v60 = vmax.f32 %v1782_v53, 0.0  ;;  %v1974_v61 = vmax.f32 %v1846_v54, 0.0  ;;  %v1648_v62 = vmul.f32 %v2973_v52, %v1038_v57  ;;  %v1712_v63 = vmul.f32 %v2973_v52, %v1358_v59  ;;  %v1040_v0 = vpop.f32.mrb[19].mxu0  ;;  %1302 = vmatmul.mubr.f32.gmra.mrb[124].mxu0 %v387_v50  ;;  %v1360_v1 = vpop.f32.mrb[19].mxu1  ;;  %1622 = vmatmul.mubr.f32.gmra.mrb[124].mxu1 %v515_v51 }
 0x127   : > { %2352 = vmatprep.mubr.msk.f32.mxu0 %vm538_vm0, %v390_v55  ;;  %2416 = vmatprep.mubr.msk.f32.mxu1 %vm538_vm0, %v518_v56 }
 0x128   : > { %2039 = vst.msk [vmem:[%s3000_s24 + $0x40] sm:$0xff] %vm2030_vm2, %v1910_v60  ;;  %2103 = vst.msk [vmem:[%s3000_s24 + $0x240] sm:$0xff] %vm2030_vm2, %v1974_v61  ;;  %v1783_v4 = vadd.f32 %v2984_v58, %v1648_v62  ;;  %v1847_v5 = vadd.f32 %v2984_v58, %v1712_v63 }
 0x129   : > { %v1043_v6 = vpop.f32.mrb[20].mxu0  ;;  %v1363_v7 = vpop.f32.mrb[20].mxu1 }
 0x12a   : > { %v1911_v8 = vmax.f32 %v1783_v4, 0.0  ;;  %v1975_v9 = vmax.f32 %v1847_v5, 0.0  ;;  %v1649_v10 = vmul.f32 %v2973_v52, %v1043_v6  ;;  %v1713_v11 = vmul.f32 %v2973_v52, %v1363_v7  ;;  %v1045_v12 = vpop.f32.mrb[21].mxu0  ;;  %1307 = vmatmul.mubr.f32.gmra.mrb[126].mxu0 %v389_v2  ;;  %v1365_v13 = vpop.f32.mrb[21].mxu1  ;;  %1627 = vmatmul.mubr.f32.gmra.mrb[126].mxu1 %v517_v3 }
 0x12c   : > { %2040 = vst.msk [vmem:[%s3000_s24 + $0x48] sm:$0xff] %vm2030_vm2, %v1911_v8  ;;  %2104 = vst.msk [vmem:[%s3000_s24 + $0x248] sm:$0xff] %vm2030_vm2, %v1975_v9  ;;  %v1784_v14 = vadd.f32 %v2984_v58, %v1649_v10  ;;  %v1848_v15 = vadd.f32 %v2984_v58, %v1713_v11 }
 0x12d   : > { %v1048_v16 = vpop.f32.mrb[22].mxu0  ;;  %v1368_v17 = vpop.f32.mrb[22].mxu1 }
 0x12e   : > { %v1912_v18 = vmax.f32 %v1784_v14, 0.0  ;;  %v1976_v19 = vmax.f32 %v1848_v15, 0.0  ;;  %v1650_v20 = vmul.f32 %v2973_v52, %v1048_v16  ;;  %v1714_v21 = vmul.f32 %v2973_v52, %v1368_v17  ;;  %v1050_v22 = vpop.f32.mrb[23].mxu0  ;;  %v1370_v23 = vpop.f32.mrb[23].mxu1 }
 0x130   : > { %2041 = vst.msk [vmem:[%s3000_s24 + $0x50] sm:$0xff] %vm2030_vm2, %v1912_v18  ;;  %2105 = vst.msk [vmem:[%s3000_s24 + $0x250] sm:$0xff] %vm2030_vm2, %v1976_v19  ;;  %v1785_v24 = vadd.f32 %v2984_v58, %v1650_v20  ;;  %v1849_v25 = vadd.f32 %v2984_v58, %v1714_v21 }
 0x131   : > { %v1053_v26 = vpop.f32.mrb[24].mxu0  ;;  %v1373_v27 = vpop.f32.mrb[24].mxu1 }
 0x132   : > { %v1913_v28 = vmax.f32 %v1785_v24, 0.0  ;;  %v1977_v29 = vmax.f32 %v1849_v25, 0.0  ;;  %v1651_v30 = vmul.f32 %v2973_v52, %v1053_v26  ;;  %v1715_v31 = vmul.f32 %v2973_v52, %v1373_v27  ;;  %v1055_v32 = vpop.f32.mrb[25].mxu0  ;;  %v1375_v33 = vpop.f32.mrb[25].mxu1 }
 0x134   : > { %2042 = vst.msk [vmem:[%s3000_s24 + $0x58] sm:$0xff] %vm2030_vm2, %v1913_v28  ;;  %2106 = vst.msk [vmem:[%s3000_s24 + $0x258] sm:$0xff] %vm2030_vm2, %v1977_v29  ;;  %v1786_v34 = vadd.f32 %v2984_v58, %v1651_v30  ;;  %v1850_v35 = vadd.f32 %v2984_v58, %v1715_v31 }
 0x135   : > { %v1058_v36 = vpop.f32.mrb[26].mxu0  ;;  %v1378_v37 = vpop.f32.mrb[26].mxu1 }
 0x136   : > { %v1914_v38 = vmax.f32 %v1786_v34, 0.0  ;;  %v1978_v39 = vmax.f32 %v1850_v35, 0.0  ;;  %v1652_v40 = vmul.f32 %v2973_v52, %v1058_v36  ;;  %v1716_v41 = vmul.f32 %v2973_v52, %v1378_v37  ;;  %v1060_v42 = vpop.f32.mrb[27].mxu0  ;;  %v1380_v43 = vpop.f32.mrb[27].mxu1 }
 0x138   : > { %2043 = vst.msk [vmem:[%s3000_s24 + $0x60] sm:$0xff] %vm2030_vm2, %v1914_v38  ;;  %2107 = vst.msk [vmem:[%s3000_s24 + $0x260] sm:$0xff] %vm2030_vm2, %v1978_v39  ;;  %v1787_v44 = vadd.f32 %v2984_v58, %v1652_v40  ;;  %v1851_v45 = vadd.f32 %v2984_v58, %v1716_v41 }
 0x139   : > { %v1063_v46 = vpop.f32.mrb[28].mxu0  ;;  %v1383_v47 = vpop.f32.mrb[28].mxu1 }
 0x13a   : > { %v1915_v48 = vmax.f32 %v1787_v44, 0.0  ;;  %v1979_v49 = vmax.f32 %v1851_v45, 0.0  ;;  %v1653_v50 = vmul.f32 %v2973_v52, %v1063_v46  ;;  %v1717_v51 = vmul.f32 %v2973_v52, %v1383_v47  ;;  %v1065_v53 = vpop.f32.mrb[29].mxu0  ;;  %v1385_v54 = vpop.f32.mrb[29].mxu1 }
 0x13c   : > { %2044 = vst.msk [vmem:[%s3000_s24 + $0x68] sm:$0xff] %vm2030_vm2, %v1915_v48  ;;  %2108 = vst.msk [vmem:[%s3000_s24 + $0x268] sm:$0xff] %vm2030_vm2, %v1979_v49  ;;  %v1788_v55 = vadd.f32 %v2984_v58, %v1653_v50  ;;  %v1852_v56 = vadd.f32 %v2984_v58, %v1717_v51 }
 0x13d   : > { %v1068_v57 = vpop.f32.mrb[30].mxu0  ;;  %v1388_v59 = vpop.f32.mrb[30].mxu1 }
 0x13e   : > { %v1916_v60 = vmax.f32 %v1788_v55, 0.0  ;;  %v1980_v61 = vmax.f32 %v1852_v56, 0.0  ;;  %v1654_v62 = vmul.f32 %v2973_v52, %v1068_v57  ;;  %v1718_v63 = vmul.f32 %v2973_v52, %v1388_v59  ;;  %v1070_v0 = vpop.f32.mrb[31].mxu0  ;;  %v1390_v1 = vpop.f32.mrb[31].mxu1 }
 0x140   : > { %2045 = vst.msk [vmem:[%s3000_s24 + $0x70] sm:$0xff] %vm2030_vm2, %v1916_v60  ;;  %2109 = vst.msk [vmem:[%s3000_s24 + $0x270] sm:$0xff] %vm2030_vm2, %v1980_v61  ;;  %v1789_v2 = vadd.f32 %v2984_v58, %v1654_v62  ;;  %v1853_v3 = vadd.f32 %v2984_v58, %v1718_v63 }
 0x141   : > { %v1073_v4 = vpop.f32.mrb[32].mxu0  ;;  %v1393_v5 = vpop.f32.mrb[32].mxu1 }
 0x142   : > { %v1917_v6 = vmax.f32 %v1789_v2, 0.0  ;;  %v1981_v7 = vmax.f32 %v1853_v3, 0.0  ;;  %v1655_v8 = vmul.f32 %v2973_v52, %v1073_v4  ;;  %v1719_v9 = vmul.f32 %v2973_v52, %v1393_v5  ;;  %v1075_v10 = vpop.f32.mrb[33].mxu0  ;;  %v1395_v11 = vpop.f32.mrb[33].mxu1 }
 0x144   : > { %2046 = vst.msk [vmem:[%s3000_s24 + $0x78] sm:$0xff] %vm2030_vm2, %v1917_v6  ;;  %2110 = vst.msk [vmem:[%s3000_s24 + $0x278] sm:$0xff] %vm2030_vm2, %v1981_v7  ;;  %v1790_v12 = vadd.f32 %v2984_v58, %v1655_v8  ;;  %v1854_v13 = vadd.f32 %v2984_v58, %v1719_v9 }
 0x145   : > { %v1078_v14 = vpop.f32.mrb[34].mxu0  ;;  %v1398_v15 = vpop.f32.mrb[34].mxu1 }
 0x146   : > { %v1918_v16 = vmax.f32 %v1790_v12, 0.0  ;;  %v1982_v17 = vmax.f32 %v1854_v13, 0.0  ;;  %v1656_v18 = vmul.f32 %v2973_v52, %v1078_v14  ;;  %v1720_v19 = vmul.f32 %v2973_v52, %v1398_v15  ;;  %v1080_v20 = vpop.f32.mrb[35].mxu0  ;;  %v1400_v21 = vpop.f32.mrb[35].mxu1 }
 0x148   : > { %2047 = vst.msk [vmem:[%s3000_s24 + $0x80] sm:$0xff] %vm2030_vm2, %v1918_v16  ;;  %2111 = vst.msk [vmem:[%s3000_s24 + $0x280] sm:$0xff] %vm2030_vm2, %v1982_v17  ;;  %v1791_v22 = vadd.f32 %v2984_v58, %v1656_v18  ;;  %v1855_v23 = vadd.f32 %v2984_v58, %v1720_v19 }
 0x149   : > { %v1083_v24 = vpop.f32.mrb[36].mxu0  ;;  %v1403_v25 = vpop.f32.mrb[36].mxu1 }
 0x14a   : > { %v1919_v26 = vmax.f32 %v1791_v22, 0.0  ;;  %v1983_v27 = vmax.f32 %v1855_v23, 0.0  ;;  %v1657_v28 = vmul.f32 %v2973_v52, %v1083_v24  ;;  %v1721_v29 = vmul.f32 %v2973_v52, %v1403_v25  ;;  %v1085_v30 = vpop.f32.mrb[37].mxu0  ;;  %v1405_v31 = vpop.f32.mrb[37].mxu1 }
 0x14c   : > { %2048 = vst.msk [vmem:[%s3000_s24 + $0x88] sm:$0xff] %vm2030_vm2, %v1919_v26  ;;  %2112 = vst.msk [vmem:[%s3000_s24 + $0x288] sm:$0xff] %vm2030_vm2, %v1983_v27  ;;  %v1792_v32 = vadd.f32 %v2984_v58, %v1657_v28  ;;  %v1856_v33 = vadd.f32 %v2984_v58, %v1721_v29 }
 0x14d   : > { %v1088_v34 = vpop.f32.mrb[38].mxu0  ;;  %v1408_v35 = vpop.f32.mrb[38].mxu1 }
 0x14e   : > { %v1920_v36 = vmax.f32 %v1792_v32, 0.0  ;;  %v1984_v37 = vmax.f32 %v1856_v33, 0.0  ;;  %v1658_v38 = vmul.f32 %v2973_v52, %v1088_v34  ;;  %v1722_v39 = vmul.f32 %v2973_v52, %v1408_v35  ;;  %v1090_v40 = vpop.f32.mrb[39].mxu0  ;;  %v1410_v41 = vpop.f32.mrb[39].mxu1 }
 0x150   : > { %2049 = vst.msk [vmem:[%s3000_s24 + $0x90] sm:$0xff] %vm2030_vm2, %v1920_v36  ;;  %2113 = vst.msk [vmem:[%s3000_s24 + $0x290] sm:$0xff] %vm2030_vm2, %v1984_v37  ;;  %v1793_v42 = vadd.f32 %v2984_v58, %v1658_v38  ;;  %v1857_v43 = vadd.f32 %v2984_v58, %v1722_v39 }
 0x151   : > { %v1093_v44 = vpop.f32.mrb[40].mxu0  ;;  %v1413_v45 = vpop.f32.mrb[40].mxu1 }
 0x152   : > { %v1921_v46 = vmax.f32 %v1793_v42, 0.0  ;;  %v1985_v47 = vmax.f32 %v1857_v43, 0.0  ;;  %v1659_v48 = vmul.f32 %v2973_v52, %v1093_v44  ;;  %v1723_v49 = vmul.f32 %v2973_v52, %v1413_v45  ;;  %v1095_v50 = vpop.f32.mrb[41].mxu0  ;;  %v1415_v51 = vpop.f32.mrb[41].mxu1 }
 0x154   : > { %2050 = vst.msk [vmem:[%s3000_s24 + $0x98] sm:$0xff] %vm2030_vm2, %v1921_v46  ;;  %2114 = vst.msk [vmem:[%s3000_s24 + $0x298] sm:$0xff] %vm2030_vm2, %v1985_v47  ;;  %v1794_v53 = vadd.f32 %v2984_v58, %v1659_v48  ;;  %v1858_v54 = vadd.f32 %v2984_v58, %v1723_v49 }
 0x155   : > { %v1098_v55 = vpop.f32.mrb[42].mxu0  ;;  %v1418_v56 = vpop.f32.mrb[42].mxu1 }
 0x156   : > { %v1922_v57 = vmax.f32 %v1794_v53, 0.0  ;;  %v1986_v59 = vmax.f32 %v1858_v54, 0.0  ;;  %v1660_v60 = vmul.f32 %v2973_v52, %v1098_v55  ;;  %v1724_v61 = vmul.f32 %v2973_v52, %v1418_v56  ;;  %v1100_v62 = vpop.f32.mrb[43].mxu0  ;;  %v1420_v63 = vpop.f32.mrb[43].mxu1 }
 0x158   : > { %2051 = vst.msk [vmem:[%s3000_s24 + $0xa0] sm:$0xff] %vm2030_vm2, %v1922_v57  ;;  %2115 = vst.msk [vmem:[%s3000_s24 + $0x2a0] sm:$0xff] %vm2030_vm2, %v1986_v59  ;;  %v1795_v0 = vadd.f32 %v2984_v58, %v1660_v60  ;;  %v1859_v1 = vadd.f32 %v2984_v58, %v1724_v61 }
 0x159   : > { %v1103_v2 = vpop.f32.mrb[44].mxu0  ;;  %v1423_v3 = vpop.f32.mrb[44].mxu1 }
 0x15a   : > { %v1923_v4 = vmax.f32 %v1795_v0, 0.0  ;;  %v1987_v5 = vmax.f32 %v1859_v1, 0.0  ;;  %v1661_v6 = vmul.f32 %v2973_v52, %v1103_v2  ;;  %v1725_v7 = vmul.f32 %v2973_v52, %v1423_v3  ;;  %v1105_v8 = vpop.f32.mrb[45].mxu0  ;;  %v1425_v9 = vpop.f32.mrb[45].mxu1 }
 0x15c   : > { %2052 = vst.msk [vmem:[%s3000_s24 + $0xa8] sm:$0xff] %vm2030_vm2, %v1923_v4  ;;  %2116 = vst.msk [vmem:[%s3000_s24 + $0x2a8] sm:$0xff] %vm2030_vm2, %v1987_v5  ;;  %v1796_v10 = vadd.f32 %v2984_v58, %v1661_v6  ;;  %v1860_v11 = vadd.f32 %v2984_v58, %v1725_v7 }
 0x15d   : > { %v1108_v12 = vpop.f32.mrb[46].mxu0  ;;  %v1428_v13 = vpop.f32.mrb[46].mxu1 }
 0x15e   : > { %v1924_v14 = vmax.f32 %v1796_v10, 0.0  ;;  %v1988_v15 = vmax.f32 %v1860_v11, 0.0  ;;  %v1662_v16 = vmul.f32 %v2973_v52, %v1108_v12  ;;  %v1726_v17 = vmul.f32 %v2973_v52, %v1428_v13  ;;  %v1110_v18 = vpop.f32.mrb[47].mxu0  ;;  %v1430_v19 = vpop.f32.mrb[47].mxu1 }
 0x160   : > { %2053 = vst.msk [vmem:[%s3000_s24 + $0xb0] sm:$0xff] %vm2030_vm2, %v1924_v14  ;;  %2117 = vst.msk [vmem:[%s3000_s24 + $0x2b0] sm:$0xff] %vm2030_vm2, %v1988_v15  ;;  %v1797_v20 = vadd.f32 %v2984_v58, %v1662_v16  ;;  %v1861_v21 = vadd.f32 %v2984_v58, %v1726_v17 }
 0x161   : > { %v1113_v22 = vpop.f32.mrb[48].mxu0  ;;  %v1433_v23 = vpop.f32.mrb[48].mxu1 }
 0x162   : > { %v1925_v24 = vmax.f32 %v1797_v20, 0.0  ;;  %v1989_v25 = vmax.f32 %v1861_v21, 0.0  ;;  %v1663_v26 = vmul.f32 %v2973_v52, %v1113_v22  ;;  %v1727_v27 = vmul.f32 %v2973_v52, %v1433_v23  ;;  %v1115_v28 = vpop.f32.mrb[49].mxu0  ;;  %v1435_v29 = vpop.f32.mrb[49].mxu1 }
 0x164   : > { %2054 = vst.msk [vmem:[%s3000_s24 + $0xb8] sm:$0xff] %vm2030_vm2, %v1925_v24  ;;  %2118 = vst.msk [vmem:[%s3000_s24 + $0x2b8] sm:$0xff] %vm2030_vm2, %v1989_v25  ;;  %v1798_v30 = vadd.f32 %v2984_v58, %v1663_v26  ;;  %v1862_v31 = vadd.f32 %v2984_v58, %v1727_v27 }
 0x165   : > { %v1118_v32 = vpop.f32.mrb[50].mxu0  ;;  %v1438_v33 = vpop.f32.mrb[50].mxu1 }
 0x166   : > { %v1926_v34 = vmax.f32 %v1798_v30, 0.0  ;;  %v1990_v35 = vmax.f32 %v1862_v31, 0.0  ;;  %v1664_v36 = vmul.f32 %v2973_v52, %v1118_v32  ;;  %v1728_v37 = vmul.f32 %v2973_v52, %v1438_v33  ;;  %v1120_v38 = vpop.f32.mrb[51].mxu0  ;;  %v1440_v39 = vpop.f32.mrb[51].mxu1 }
 0x168   : > { %2055 = vst.msk [vmem:[%s3000_s24 + $0xc0] sm:$0xff] %vm2030_vm2, %v1926_v34  ;;  %2119 = vst.msk [vmem:[%s3000_s24 + $0x2c0] sm:$0xff] %vm2030_vm2, %v1990_v35  ;;  %v1799_v40 = vadd.f32 %v2984_v58, %v1664_v36  ;;  %v1863_v41 = vadd.f32 %v2984_v58, %v1728_v37 }
 0x169   : > { %v1123_v42 = vpop.f32.mrb[52].mxu0  ;;  %v1443_v43 = vpop.f32.mrb[52].mxu1 }
 0x16a   : > { %v1927_v44 = vmax.f32 %v1799_v40, 0.0  ;;  %v1991_v45 = vmax.f32 %v1863_v41, 0.0  ;;  %v1665_v46 = vmul.f32 %v2973_v52, %v1123_v42  ;;  %v1729_v47 = vmul.f32 %v2973_v52, %v1443_v43  ;;  %v1125_v48 = vpop.f32.mrb[53].mxu0  ;;  %v1445_v49 = vpop.f32.mrb[53].mxu1 }
 0x16c   : > { %2056 = vst.msk [vmem:[%s3000_s24 + $0xc8] sm:$0xff] %vm2030_vm2, %v1927_v44  ;;  %2120 = vst.msk [vmem:[%s3000_s24 + $0x2c8] sm:$0xff] %vm2030_vm2, %v1991_v45  ;;  %v1800_v50 = vadd.f32 %v2984_v58, %v1665_v46  ;;  %v1864_v51 = vadd.f32 %v2984_v58, %v1729_v47 }
 0x16d   : > { %v1128_v53 = vpop.f32.mrb[54].mxu0  ;;  %v1448_v54 = vpop.f32.mrb[54].mxu1 }
 0x16e   : > { %v1928_v55 = vmax.f32 %v1800_v50, 0.0  ;;  %v1992_v56 = vmax.f32 %v1864_v51, 0.0  ;;  %v1666_v57 = vmul.f32 %v2973_v52, %v1128_v53  ;;  %v1730_v59 = vmul.f32 %v2973_v52, %v1448_v54  ;;  %v1130_v60 = vpop.f32.mrb[55].mxu0  ;;  %v1450_v61 = vpop.f32.mrb[55].mxu1 }
 0x170   : > { %2057 = vst.msk [vmem:[%s3000_s24 + $0xd0] sm:$0xff] %vm2030_vm2, %v1928_v55  ;;  %2121 = vst.msk [vmem:[%s3000_s24 + $0x2d0] sm:$0xff] %vm2030_vm2, %v1992_v56  ;;  %v1801_v62 = vadd.f32 %v2984_v58, %v1666_v57  ;;  %v1865_v63 = vadd.f32 %v2984_v58, %v1730_v59 }
 0x171   : > { %v1133_v0 = vpop.f32.mrb[56].mxu0  ;;  %v1453_v1 = vpop.f32.mrb[56].mxu1 }
 0x172   : > { %v1929_v2 = vmax.f32 %v1801_v62, 0.0  ;;  %v1993_v3 = vmax.f32 %v1865_v63, 0.0  ;;  %v1667_v4 = vmul.f32 %v2973_v52, %v1133_v0  ;;  %v1731_v5 = vmul.f32 %v2973_v52, %v1453_v1  ;;  %v1135_v6 = vpop.f32.mrb[57].mxu0  ;;  %v1455_v7 = vpop.f32.mrb[57].mxu1 }
 0x174   : > { %2058 = vst.msk [vmem:[%s3000_s24 + $0xd8] sm:$0xff] %vm2030_vm2, %v1929_v2  ;;  %2122 = vst.msk [vmem:[%s3000_s24 + $0x2d8] sm:$0xff] %vm2030_vm2, %v1993_v3  ;;  %v1802_v8 = vadd.f32 %v2984_v58, %v1667_v4  ;;  %v1866_v9 = vadd.f32 %v2984_v58, %v1731_v5 }
 0x175   : > { %v1138_v10 = vpop.f32.mrb[58].mxu0  ;;  %v1458_v11 = vpop.f32.mrb[58].mxu1 }
 0x176   : > { %v1930_v12 = vmax.f32 %v1802_v8, 0.0  ;;  %v1994_v13 = vmax.f32 %v1866_v9, 0.0  ;;  %v1668_v14 = vmul.f32 %v2973_v52, %v1138_v10  ;;  %v1732_v15 = vmul.f32 %v2973_v52, %v1458_v11  ;;  %v1140_v16 = vpop.f32.mrb[59].mxu0  ;;  %v1460_v17 = vpop.f32.mrb[59].mxu1 }
 0x178   : > { %2059 = vst.msk [vmem:[%s3000_s24 + $0xe0] sm:$0xff] %vm2030_vm2, %v1930_v12  ;;  %2123 = vst.msk [vmem:[%s3000_s24 + $0x2e0] sm:$0xff] %vm2030_vm2, %v1994_v13  ;;  %v1803_v18 = vadd.f32 %v2984_v58, %v1668_v14  ;;  %v1867_v19 = vadd.f32 %v2984_v58, %v1732_v15  ;;  %v3330_v13 = vld [vmem:[%s3583_s2] ss:$0 sm:$0xff] }
 0x179   : > { %v1143_v20 = vpop.f32.mrb[60].mxu0  ;;  %v1463_v21 = vpop.f32.mrb[60].mxu1 }
 0x17a   : > { %v1931_v22 = vmax.f32 %v1803_v18, 0.0  ;;  %v1995_v23 = vmax.f32 %v1867_v19, 0.0  ;;  %v1669_v24 = vmul.f32 %v2973_v52, %v1143_v20  ;;  %v1733_v25 = vmul.f32 %v2973_v52, %v1463_v21  ;;  %v1145_v26 = vpop.f32.mrb[61].mxu0  ;;  %v1465_v27 = vpop.f32.mrb[61].mxu1 }
 0x17c   : > { %2060 = vst.msk [vmem:[%s3000_s24 + $0xe8] sm:$0xff] %vm2030_vm2, %v1931_v22  ;;  %2124 = vst.msk [vmem:[%s3000_s24 + $0x2e8] sm:$0xff] %vm2030_vm2, %v1995_v23  ;;  %v1804_v28 = vadd.f32 %v2984_v58, %v1669_v24  ;;  %v1868_v29 = vadd.f32 %v2984_v58, %v1733_v25 }
 0x17d   : > { %v1148_v30 = vpop.f32.mrb[62].mxu0  ;;  %v1468_v31 = vpop.f32.mrb[62].mxu1 }
 0x17e   : > { %v1932_v32 = vmax.f32 %v1804_v28, 0.0  ;;  %v1996_v33 = vmax.f32 %v1868_v29, 0.0  ;;  %v1670_v34 = vmul.f32 %v2973_v52, %v1148_v30  ;;  %v1734_v35 = vmul.f32 %v2973_v52, %v1468_v31  ;;  %v1150_v36 = vpop.f32.mrb[63].mxu0  ;;  %v1470_v37 = vpop.f32.mrb[63].mxu1 }
 0x180   : > { %2061 = vst.msk [vmem:[%s3000_s24 + $0xf0] sm:$0xff] %vm2030_vm2, %v1932_v32  ;;  %2125 = vst.msk [vmem:[%s3000_s24 + $0x2f0] sm:$0xff] %vm2030_vm2, %v1996_v33  ;;  %v1805_v38 = vadd.f32 %v2984_v58, %v1670_v34  ;;  %v1869_v39 = vadd.f32 %v2984_v58, %v1734_v35 }
 0x181   : > { %v1153_v40 = vpop.f32.mrb[64].mxu0  ;;  %v1473_v41 = vpop.f32.mrb[64].mxu1 }
 0x182   : > { %v1933_v42 = vmax.f32 %v1805_v38, 0.0  ;;  %v1997_v43 = vmax.f32 %v1869_v39, 0.0  ;;  %v1671_v44 = vmul.f32 %v2973_v52, %v1153_v40  ;;  %v1735_v45 = vmul.f32 %v2973_v52, %v1473_v41  ;;  %v1155_v46 = vpop.f32.mrb[65].mxu0  ;;  %v1475_v47 = vpop.f32.mrb[65].mxu1 }
 0x184   : > { %2062 = vst.msk [vmem:[%s3000_s24 + $0xf8] sm:$0xff] %vm2030_vm2, %v1933_v42  ;;  %2126 = vst.msk [vmem:[%s3000_s24 + $0x2f8] sm:$0xff] %vm2030_vm2, %v1997_v43  ;;  %v1806_v48 = vadd.f32 %v2984_v58, %v1671_v44  ;;  %v1870_v49 = vadd.f32 %v2984_v58, %v1735_v45 }
 0x185   : > { %v1158_v50 = vpop.f32.mrb[66].mxu0  ;;  %v1478_v51 = vpop.f32.mrb[66].mxu1 }
 0x186   : > { %v1934_v53 = vmax.f32 %v1806_v48, 0.0  ;;  %v1998_v54 = vmax.f32 %v1870_v49, 0.0  ;;  %v1672_v55 = vmul.f32 %v2973_v52, %v1158_v50  ;;  %v1736_v56 = vmul.f32 %v2973_v52, %v1478_v51  ;;  %v1160_v57 = vpop.f32.mrb[67].mxu0  ;;  %v1480_v59 = vpop.f32.mrb[67].mxu1 }
 0x188   : > { %2063 = vst.msk [vmem:[%s3000_s24 + $0x100] sm:$0xff] %vm2030_vm2, %v1934_v53  ;;  %2127 = vst.msk [vmem:[%s3000_s24 + $0x300] sm:$0xff] %vm2030_vm2, %v1998_v54  ;;  %v1807_v60 = vadd.f32 %v2984_v58, %v1672_v55  ;;  %v1871_v61 = vadd.f32 %v2984_v58, %v1736_v56 }
 0x189   : > { %v1163_v62 = vpop.f32.mrb[68].mxu0  ;;  %v1483_v63 = vpop.f32.mrb[68].mxu1 }
 0x18a   : > { %v1935_v0 = vmax.f32 %v1807_v60, 0.0  ;;  %v1999_v1 = vmax.f32 %v1871_v61, 0.0  ;;  %v1673_v2 = vmul.f32 %v2973_v52, %v1163_v62  ;;  %v1737_v3 = vmul.f32 %v2973_v52, %v1483_v63  ;;  %v1165_v4 = vpop.f32.mrb[69].mxu0  ;;  %v1485_v5 = vpop.f32.mrb[69].mxu1 }
 0x18c   : > { %2064 = vst.msk [vmem:[%s3000_s24 + $0x108] sm:$0xff] %vm2030_vm2, %v1935_v0  ;;  %2128 = vst.msk [vmem:[%s3000_s24 + $0x308] sm:$0xff] %vm2030_vm2, %v1999_v1  ;;  %v1808_v6 = vadd.f32 %v2984_v58, %v1673_v2  ;;  %v1872_v7 = vadd.f32 %v2984_v58, %v1737_v3 }
 0x18d   : > { %v1168_v8 = vpop.f32.mrb[70].mxu0  ;;  %v1488_v9 = vpop.f32.mrb[70].mxu1 }
 0x18e   : > { %v1936_v10 = vmax.f32 %v1808_v6, 0.0  ;;  %v2000_v11 = vmax.f32 %v1872_v7, 0.0  ;;  %v1674_v12 = vmul.f32 %v2973_v52, %v1168_v8  ;;  %v1738_v14 = vmul.f32 %v3330_v13, %v1488_v9  ;;  %v1170_v15 = vpop.f32.mrb[71].mxu0  ;;  %v1490_v16 = vpop.f32.mrb[71].mxu1 }
 0x190   : > { %2065 = vst.msk [vmem:[%s3000_s24 + $0x110] sm:$0xff] %vm2030_vm2, %v1936_v10  ;;  %2129 = vst.msk [vmem:[%s3000_s24 + $0x310] sm:$0xff] %vm2030_vm2, %v2000_v11  ;;  %v1809_v17 = vadd.f32 %v2984_v58, %v1674_v12  ;;  %v1873_v18 = vadd.f32 %v2984_v58, %v1738_v14  ;;  %v3348_v58 = vld [vmem:[%s3584_s3] ss:$0 sm:$0xff] }
 0x191   : > { %v1173_v52 = vpop.f32.mrb[72].mxu0  ;;  %v1493_v19 = vpop.f32.mrb[72].mxu1 }
 0x192   : > { %v1937_v20 = vmax.f32 %v1809_v17, 0.0  ;;  %v2001_v21 = vmax.f32 %v1873_v18, 0.0  ;;  %v1675_v22 = vmul.f32 %v3330_v13, %v1173_v52  ;;  %v1739_v23 = vmul.f32 %v3330_v13, %v1493_v19  ;;  %v1175_v24 = vpop.f32.mrb[73].mxu0  ;;  %v1495_v25 = vpop.f32.mrb[73].mxu1 }
 0x194   : > { %2066 = vst.msk [vmem:[%s3000_s24 + $0x118] sm:$0xff] %vm2030_vm2, %v1937_v20  ;;  %2130 = vst.msk [vmem:[%s3000_s24 + $0x318] sm:$0xff] %vm2030_vm2, %v2001_v21  ;;  %v1810_v26 = vadd.f32 %v3348_v58, %v1675_v22  ;;  %v1874_v27 = vadd.f32 %v3348_v58, %v1739_v23 }
 0x195   : > { %v1178_v28 = vpop.f32.mrb[74].mxu0  ;;  %v1498_v29 = vpop.f32.mrb[74].mxu1 }
 0x196   : > { %v1938_v30 = vmax.f32 %v1810_v26, 0.0  ;;  %v2002_v31 = vmax.f32 %v1874_v27, 0.0  ;;  %v1676_v32 = vmul.f32 %v3330_v13, %v1178_v28  ;;  %v1740_v33 = vmul.f32 %v3330_v13, %v1498_v29  ;;  %v1180_v34 = vpop.f32.mrb[75].mxu0  ;;  %v1500_v35 = vpop.f32.mrb[75].mxu1 }
 0x198   : > { %2067 = vst.msk [vmem:[%s3000_s24 + $0x120] sm:$0xff] %vm2030_vm2, %v1938_v30  ;;  %2131 = vst.msk [vmem:[%s3000_s24 + $0x320] sm:$0xff] %vm2030_vm2, %v2002_v31  ;;  %v1811_v36 = vadd.f32 %v3348_v58, %v1676_v32  ;;  %v1875_v37 = vadd.f32 %v3348_v58, %v1740_v33 }
 0x199   : > { %v1183_v38 = vpop.f32.mrb[76].mxu0  ;;  %v1503_v39 = vpop.f32.mrb[76].mxu1 }
 0x19a   : > { %v1939_v40 = vmax.f32 %v1811_v36, 0.0  ;;  %v2003_v41 = vmax.f32 %v1875_v37, 0.0  ;;  %v1677_v42 = vmul.f32 %v3330_v13, %v1183_v38  ;;  %v1741_v43 = vmul.f32 %v3330_v13, %v1503_v39  ;;  %v1185_v44 = vpop.f32.mrb[77].mxu0  ;;  %v1505_v45 = vpop.f32.mrb[77].mxu1 }
 0x19c   : > { %2068 = vst.msk [vmem:[%s3000_s24 + $0x128] sm:$0xff] %vm2030_vm2, %v1939_v40  ;;  %2132 = vst.msk [vmem:[%s3000_s24 + $0x328] sm:$0xff] %vm2030_vm2, %v2003_v41  ;;  %v1812_v46 = vadd.f32 %v3348_v58, %v1677_v42  ;;  %v1876_v47 = vadd.f32 %v3348_v58, %v1741_v43 }
 0x19d   : > { %v1188_v48 = vpop.f32.mrb[78].mxu0  ;;  %v1508_v49 = vpop.f32.mrb[78].mxu1 }
 0x19e   : > { %v1940_v50 = vmax.f32 %v1812_v46, 0.0  ;;  %v2004_v51 = vmax.f32 %v1876_v47, 0.0  ;;  %v1678_v53 = vmul.f32 %v3330_v13, %v1188_v48  ;;  %v1742_v54 = vmul.f32 %v3330_v13, %v1508_v49  ;;  %v1190_v55 = vpop.f32.mrb[79].mxu0  ;;  %v1510_v56 = vpop.f32.mrb[79].mxu1 }
 0x1a0   : > { %2069 = vst.msk [vmem:[%s3000_s24 + $0x130] sm:$0xff] %vm2030_vm2, %v1940_v50  ;;  %2133 = vst.msk [vmem:[%s3000_s24 + $0x330] sm:$0xff] %vm2030_vm2, %v2004_v51  ;;  %v1813_v57 = vadd.f32 %v3348_v58, %v1678_v53  ;;  %v1877_v59 = vadd.f32 %v3348_v58, %v1742_v54 }
 0x1a1   : > { %v1193_v60 = vpop.f32.mrb[80].mxu0  ;;  %v1513_v61 = vpop.f32.mrb[80].mxu1 }
 0x1a2   : > { %v1941_v62 = vmax.f32 %v1813_v57, 0.0  ;;  %v2005_v63 = vmax.f32 %v1877_v59, 0.0  ;;  %v1679_v0 = vmul.f32 %v3330_v13, %v1193_v60  ;;  %v1743_v1 = vmul.f32 %v3330_v13, %v1513_v61  ;;  %v1195_v2 = vpop.f32.mrb[81].mxu0  ;;  %v1515_v3 = vpop.f32.mrb[81].mxu1 }
 0x1a4   : > { %2070 = vst.msk [vmem:[%s3000_s24 + $0x138] sm:$0xff] %vm2030_vm2, %v1941_v62  ;;  %2134 = vst.msk [vmem:[%s3000_s24 + $0x338] sm:$0xff] %vm2030_vm2, %v2005_v63  ;;  %v1814_v4 = vadd.f32 %v3348_v58, %v1679_v0  ;;  %v1878_v5 = vadd.f32 %v3348_v58, %v1743_v1 }
 0x1a5   : > { %v1198_v6 = vpop.f32.mrb[82].mxu0  ;;  %v1518_v7 = vpop.f32.mrb[82].mxu1 }
 0x1a6   : > { %v1942_v8 = vmax.f32 %v1814_v4, 0.0  ;;  %v2006_v9 = vmax.f32 %v1878_v5, 0.0  ;;  %v1680_v10 = vmul.f32 %v3330_v13, %v1198_v6  ;;  %v1744_v11 = vmul.f32 %v3330_v13, %v1518_v7  ;;  %v1200_v12 = vpop.f32.mrb[83].mxu0  ;;  %v1520_v14 = vpop.f32.mrb[83].mxu1 }
 0x1a8   : > { %2071 = vst.msk [vmem:[%s3000_s24 + $0x140] sm:$0xff] %vm2030_vm2, %v1942_v8  ;;  %2135 = vst.msk [vmem:[%s3000_s24 + $0x340] sm:$0xff] %vm2030_vm2, %v2006_v9  ;;  %v1815_v15 = vadd.f32 %v3348_v58, %v1680_v10  ;;  %v1879_v16 = vadd.f32 %v3348_v58, %v1744_v11 }
 0x1a9   : > { %v1203_v17 = vpop.f32.mrb[84].mxu0  ;;  %v1523_v18 = vpop.f32.mrb[84].mxu1 }
 0x1aa   : > { %v1943_v52 = vmax.f32 %v1815_v15, 0.0  ;;  %v2007_v19 = vmax.f32 %v1879_v16, 0.0  ;;  %v1681_v20 = vmul.f32 %v3330_v13, %v1203_v17  ;;  %v1745_v21 = vmul.f32 %v3330_v13, %v1523_v18  ;;  %v1205_v22 = vpop.f32.mrb[85].mxu0  ;;  %v1525_v23 = vpop.f32.mrb[85].mxu1 }
 0x1ac   : > { %2072 = vst.msk [vmem:[%s3000_s24 + $0x148] sm:$0xff] %vm2030_vm2, %v1943_v52  ;;  %2136 = vst.msk [vmem:[%s3000_s24 + $0x348] sm:$0xff] %vm2030_vm2, %v2007_v19  ;;  %v1816_v24 = vadd.f32 %v3348_v58, %v1681_v20  ;;  %v1880_v25 = vadd.f32 %v3348_v58, %v1745_v21 }
 0x1ad   : > { %v1208_v26 = vpop.f32.mrb[86].mxu0  ;;  %v1528_v27 = vpop.f32.mrb[86].mxu1 }
 0x1ae   : > { %v1944_v28 = vmax.f32 %v1816_v24, 0.0  ;;  %v2008_v29 = vmax.f32 %v1880_v25, 0.0  ;;  %v1682_v30 = vmul.f32 %v3330_v13, %v1208_v26  ;;  %v1746_v31 = vmul.f32 %v3330_v13, %v1528_v27  ;;  %v1210_v32 = vpop.f32.mrb[87].mxu0  ;;  %v1530_v33 = vpop.f32.mrb[87].mxu1 }
 0x1b0   : > { %2073 = vst.msk [vmem:[%s3000_s24 + $0x150] sm:$0xff] %vm2030_vm2, %v1944_v28  ;;  %2137 = vst.msk [vmem:[%s3000_s24 + $0x350] sm:$0xff] %vm2030_vm2, %v2008_v29  ;;  %v1817_v34 = vadd.f32 %v3348_v58, %v1682_v30  ;;  %v1881_v35 = vadd.f32 %v3348_v58, %v1746_v31 }
 0x1b1   : > { %v1213_v36 = vpop.f32.mrb[88].mxu0  ;;  %v1533_v37 = vpop.f32.mrb[88].mxu1 }
 0x1b2   : > { %v1945_v38 = vmax.f32 %v1817_v34, 0.0  ;;  %v2009_v39 = vmax.f32 %v1881_v35, 0.0  ;;  %v1683_v40 = vmul.f32 %v3330_v13, %v1213_v36  ;;  %v1747_v41 = vmul.f32 %v3330_v13, %v1533_v37  ;;  %v1215_v42 = vpop.f32.mrb[89].mxu0  ;;  %v1535_v43 = vpop.f32.mrb[89].mxu1 }
 0x1b4   : > { %2074 = vst.msk [vmem:[%s3000_s24 + $0x158] sm:$0xff] %vm2030_vm2, %v1945_v38  ;;  %2138 = vst.msk [vmem:[%s3000_s24 + $0x358] sm:$0xff] %vm2030_vm2, %v2009_v39  ;;  %v1818_v44 = vadd.f32 %v3348_v58, %v1683_v40  ;;  %v1882_v45 = vadd.f32 %v3348_v58, %v1747_v41 }
 0x1b5   : > { %v1218_v46 = vpop.f32.mrb[90].mxu0  ;;  %v1538_v47 = vpop.f32.mrb[90].mxu1 }
 0x1b6   : > { %v1946_v48 = vmax.f32 %v1818_v44, 0.0  ;;  %v2010_v49 = vmax.f32 %v1882_v45, 0.0  ;;  %v1684_v50 = vmul.f32 %v3330_v13, %v1218_v46  ;;  %v1748_v51 = vmul.f32 %v3330_v13, %v1538_v47  ;;  %v1220_v53 = vpop.f32.mrb[91].mxu0  ;;  %v1540_v54 = vpop.f32.mrb[91].mxu1 }
 0x1b8   : > { %2075 = vst.msk [vmem:[%s3000_s24 + $0x160] sm:$0xff] %vm2030_vm2, %v1946_v48  ;;  %2139 = vst.msk [vmem:[%s3000_s24 + $0x360] sm:$0xff] %vm2030_vm2, %v2010_v49  ;;  %v1819_v55 = vadd.f32 %v3348_v58, %v1684_v50  ;;  %v1883_v56 = vadd.f32 %v3348_v58, %v1748_v51 }
 0x1b9   : > { %v1223_v57 = vpop.f32.mrb[92].mxu0  ;;  %v1543_v59 = vpop.f32.mrb[92].mxu1 }
 0x1ba   : > { %v1947_v60 = vmax.f32 %v1819_v55, 0.0  ;;  %v2011_v61 = vmax.f32 %v1883_v56, 0.0  ;;  %v1685_v62 = vmul.f32 %v3330_v13, %v1223_v57  ;;  %v1749_v63 = vmul.f32 %v3330_v13, %v1543_v59  ;;  %v1225_v0 = vpop.f32.mrb[93].mxu0  ;;  %v1545_v1 = vpop.f32.mrb[93].mxu1 }
 0x1bc   : > { %2076 = vst.msk [vmem:[%s3000_s24 + $0x168] sm:$0xff] %vm2030_vm2, %v1947_v60  ;;  %2140 = vst.msk [vmem:[%s3000_s24 + $0x368] sm:$0xff] %vm2030_vm2, %v2011_v61  ;;  %v1820_v2 = vadd.f32 %v3348_v58, %v1685_v62  ;;  %v1884_v3 = vadd.f32 %v3348_v58, %v1749_v63 }
 0x1bd   : > { %v1228_v4 = vpop.f32.mrb[94].mxu0  ;;  %v1548_v5 = vpop.f32.mrb[94].mxu1 }
 0x1be   : > { %v1948_v6 = vmax.f32 %v1820_v2, 0.0  ;;  %v2012_v7 = vmax.f32 %v1884_v3, 0.0  ;;  %v1686_v8 = vmul.f32 %v3330_v13, %v1228_v4  ;;  %v1750_v9 = vmul.f32 %v3330_v13, %v1548_v5  ;;  %v1230_v10 = vpop.f32.mrb[95].mxu0  ;;  %v1550_v11 = vpop.f32.mrb[95].mxu1 }
 0x1c0   : > { %2077 = vst.msk [vmem:[%s3000_s24 + $0x170] sm:$0xff] %vm2030_vm2, %v1948_v6  ;;  %2141 = vst.msk [vmem:[%s3000_s24 + $0x370] sm:$0xff] %vm2030_vm2, %v2012_v7  ;;  %v1821_v12 = vadd.f32 %v3348_v58, %v1686_v8  ;;  %v1885_v14 = vadd.f32 %v3348_v58, %v1750_v9 }
 0x1c1   : > { %v1233_v15 = vpop.f32.mrb[96].mxu0  ;;  %v1553_v16 = vpop.f32.mrb[96].mxu1 }
 0x1c2   : > { %v1949_v17 = vmax.f32 %v1821_v12, 0.0  ;;  %v2013_v18 = vmax.f32 %v1885_v14, 0.0  ;;  %v1687_v52 = vmul.f32 %v3330_v13, %v1233_v15  ;;  %v1751_v19 = vmul.f32 %v3330_v13, %v1553_v16  ;;  %v1235_v20 = vpop.f32.mrb[97].mxu0  ;;  %v1555_v21 = vpop.f32.mrb[97].mxu1 }
 0x1c4   : > { %2078 = vst.msk [vmem:[%s3000_s24 + $0x178] sm:$0xff] %vm2030_vm2, %v1949_v17  ;;  %2142 = vst.msk [vmem:[%s3000_s24 + $0x378] sm:$0xff] %vm2030_vm2, %v2013_v18  ;;  %v1822_v22 = vadd.f32 %v3348_v58, %v1687_v52  ;;  %v1886_v23 = vadd.f32 %v3348_v58, %v1751_v19 }
 0x1c5   : > { %v1238_v24 = vpop.f32.mrb[98].mxu0  ;;  %v1558_v25 = vpop.f32.mrb[98].mxu1 }
 0x1c6   : > { %v1950_v26 = vmax.f32 %v1822_v22, 0.0  ;;  %v2014_v27 = vmax.f32 %v1886_v23, 0.0  ;;  %v1688_v28 = vmul.f32 %v3330_v13, %v1238_v24  ;;  %v1752_v29 = vmul.f32 %v3330_v13, %v1558_v25  ;;  %v1240_v30 = vpop.f32.mrb[99].mxu0  ;;  %v1560_v31 = vpop.f32.mrb[99].mxu1 }
 0x1c8   : > { %2079 = vst.msk [vmem:[%s3000_s24 + $0x180] sm:$0xff] %vm2030_vm2, %v1950_v26  ;;  %2143 = vst.msk [vmem:[%s3000_s24 + $0x380] sm:$0xff] %vm2030_vm2, %v2014_v27  ;;  %v1823_v32 = vadd.f32 %v3348_v58, %v1688_v28  ;;  %v1887_v33 = vadd.f32 %v3348_v58, %v1752_v29 }
 0x1c9   : > { %v1243_v34 = vpop.f32.mrb[100].mxu0  ;;  %v1563_v35 = vpop.f32.mrb[100].mxu1 }
 0x1ca   : > { %v1951_v36 = vmax.f32 %v1823_v32, 0.0  ;;  %v2015_v37 = vmax.f32 %v1887_v33, 0.0  ;;  %v1689_v38 = vmul.f32 %v3330_v13, %v1243_v34  ;;  %v1753_v39 = vmul.f32 %v3330_v13, %v1563_v35  ;;  %v1245_v40 = vpop.f32.mrb[101].mxu0  ;;  %v1565_v41 = vpop.f32.mrb[101].mxu1 }
 0x1cc   : > { %2080 = vst.msk [vmem:[%s3000_s24 + $0x188] sm:$0xff] %vm2030_vm2, %v1951_v36  ;;  %2144 = vst.msk [vmem:[%s3000_s24 + $0x388] sm:$0xff] %vm2030_vm2, %v2015_v37  ;;  %v1824_v42 = vadd.f32 %v3348_v58, %v1689_v38  ;;  %v1888_v43 = vadd.f32 %v3348_v58, %v1753_v39 }
 0x1cd   : > { %v1248_v44 = vpop.f32.mrb[102].mxu0  ;;  %v1568_v45 = vpop.f32.mrb[102].mxu1 }
 0x1ce   : > { %v1952_v46 = vmax.f32 %v1824_v42, 0.0  ;;  %v2016_v47 = vmax.f32 %v1888_v43, 0.0  ;;  %v1690_v48 = vmul.f32 %v3330_v13, %v1248_v44  ;;  %v1754_v49 = vmul.f32 %v3330_v13, %v1568_v45  ;;  %v1250_v50 = vpop.f32.mrb[103].mxu0  ;;  %v1570_v51 = vpop.f32.mrb[103].mxu1 }
 0x1d0   : > { %2081 = vst.msk [vmem:[%s3000_s24 + $0x190] sm:$0xff] %vm2030_vm2, %v1952_v46  ;;  %2145 = vst.msk [vmem:[%s3000_s24 + $0x390] sm:$0xff] %vm2030_vm2, %v2016_v47  ;;  %v1825_v53 = vadd.f32 %v3348_v58, %v1690_v48  ;;  %v1889_v54 = vadd.f32 %v3348_v58, %v1754_v49 }
 0x1d1   : > { %v1253_v55 = vpop.f32.mrb[104].mxu0  ;;  %v1573_v56 = vpop.f32.mrb[104].mxu1 }
 0x1d2   : > { %v1953_v57 = vmax.f32 %v1825_v53, 0.0  ;;  %v2017_v59 = vmax.f32 %v1889_v54, 0.0  ;;  %v1691_v60 = vmul.f32 %v3330_v13, %v1253_v55  ;;  %v1755_v61 = vmul.f32 %v3330_v13, %v1573_v56  ;;  %v1255_v62 = vpop.f32.mrb[105].mxu0  ;;  %v1575_v63 = vpop.f32.mrb[105].mxu1 }
 0x1d4   : > { %2082 = vst.msk [vmem:[%s3000_s24 + $0x198] sm:$0xff] %vm2030_vm2, %v1953_v57  ;;  %2146 = vst.msk [vmem:[%s3000_s24 + $0x398] sm:$0xff] %vm2030_vm2, %v2017_v59  ;;  %v1826_v0 = vadd.f32 %v3348_v58, %v1691_v60  ;;  %v1890_v1 = vadd.f32 %v3348_v58, %v1755_v61 }
 0x1d5   : > { %v1258_v2 = vpop.f32.mrb[106].mxu0  ;;  %v1578_v3 = vpop.f32.mrb[106].mxu1 }
 0x1d6   : > { %v1954_v4 = vmax.f32 %v1826_v0, 0.0  ;;  %v2018_v5 = vmax.f32 %v1890_v1, 0.0  ;;  %v1692_v6 = vmul.f32 %v3330_v13, %v1258_v2  ;;  %v1756_v7 = vmul.f32 %v3330_v13, %v1578_v3  ;;  %v1260_v8 = vpop.f32.mrb[107].mxu0  ;;  %v1580_v9 = vpop.f32.mrb[107].mxu1 }
 0x1d8   : > { %2083 = vst.msk [vmem:[%s3000_s24 + $0x1a0] sm:$0xff] %vm2030_vm2, %v1954_v4  ;;  %2147 = vst.msk [vmem:[%s3000_s24 + $0x3a0] sm:$0xff] %vm2030_vm2, %v2018_v5  ;;  %v1827_v10 = vadd.f32 %v3348_v58, %v1692_v6  ;;  %v1891_v11 = vadd.f32 %v3348_v58, %v1756_v7 }
 0x1d9   : > { %v1263_v12 = vpop.f32.mrb[108].mxu0  ;;  %v1583_v14 = vpop.f32.mrb[108].mxu1 }
 0x1da   : > { %v1955_v15 = vmax.f32 %v1827_v10, 0.0  ;;  %v2019_v16 = vmax.f32 %v1891_v11, 0.0  ;;  %v1693_v17 = vmul.f32 %v3330_v13, %v1263_v12  ;;  %v1757_v18 = vmul.f32 %v3330_v13, %v1583_v14  ;;  %v1265_v52 = vpop.f32.mrb[109].mxu0  ;;  %v1585_v19 = vpop.f32.mrb[109].mxu1 }
 0x1dc   : > { %2084 = vst.msk [vmem:[%s3000_s24 + $0x1a8] sm:$0xff] %vm2030_vm2, %v1955_v15  ;;  %2148 = vst.msk [vmem:[%s3000_s24 + $0x3a8] sm:$0xff] %vm2030_vm2, %v2019_v16  ;;  %v1828_v20 = vadd.f32 %v3348_v58, %v1693_v17  ;;  %v1892_v21 = vadd.f32 %v3348_v58, %v1757_v18 }
 0x1dd   : > { %v1268_v22 = vpop.f32.mrb[110].mxu0  ;;  %v1588_v23 = vpop.f32.mrb[110].mxu1 }
 0x1de   : > { %v1956_v24 = vmax.f32 %v1828_v20, 0.0  ;;  %v2020_v25 = vmax.f32 %v1892_v21, 0.0  ;;  %v1694_v26 = vmul.f32 %v3330_v13, %v1268_v22  ;;  %v1758_v27 = vmul.f32 %v3330_v13, %v1588_v23  ;;  %v1270_v28 = vpop.f32.mrb[111].mxu0  ;;  %v1590_v29 = vpop.f32.mrb[111].mxu1 }
 0x1e0   : > { %2085 = vst.msk [vmem:[%s3000_s24 + $0x1b0] sm:$0xff] %vm2030_vm2, %v1956_v24  ;;  %2149 = vst.msk [vmem:[%s3000_s24 + $0x3b0] sm:$0xff] %vm2030_vm2, %v2020_v25  ;;  %v1829_v30 = vadd.f32 %v3348_v58, %v1694_v26  ;;  %v1893_v31 = vadd.f32 %v3348_v58, %v1758_v27 }
 0x1e1   : > { %v1273_v32 = vpop.f32.mrb[112].mxu0  ;;  %v1593_v33 = vpop.f32.mrb[112].mxu1 }
 0x1e2   : > { %v1957_v34 = vmax.f32 %v1829_v30, 0.0  ;;  %v2021_v35 = vmax.f32 %v1893_v31, 0.0  ;;  %v1695_v36 = vmul.f32 %v3330_v13, %v1273_v32  ;;  %v1759_v37 = vmul.f32 %v3330_v13, %v1593_v33  ;;  %v1275_v38 = vpop.f32.mrb[113].mxu0  ;;  %v1595_v39 = vpop.f32.mrb[113].mxu1 }
 0x1e4   : > { %2086 = vst.msk [vmem:[%s3000_s24 + $0x1b8] sm:$0xff] %vm2030_vm2, %v1957_v34  ;;  %2150 = vst.msk [vmem:[%s3000_s24 + $0x3b8] sm:$0xff] %vm2030_vm2, %v2021_v35  ;;  %v1830_v40 = vadd.f32 %v3348_v58, %v1695_v36  ;;  %v1894_v41 = vadd.f32 %v3348_v58, %v1759_v37 }
 0x1e5   : > { %v1278_v42 = vpop.f32.mrb[114].mxu0  ;;  %v1598_v43 = vpop.f32.mrb[114].mxu1 }
 0x1e6   : > { %v1958_v44 = vmax.f32 %v1830_v40, 0.0  ;;  %v2022_v45 = vmax.f32 %v1894_v41, 0.0  ;;  %v1696_v46 = vmul.f32 %v3330_v13, %v1278_v42  ;;  %v1760_v47 = vmul.f32 %v3330_v13, %v1598_v43  ;;  %v1280_v48 = vpop.f32.mrb[115].mxu0  ;;  %v1600_v49 = vpop.f32.mrb[115].mxu1 }
 0x1e8   : > { %2087 = vst.msk [vmem:[%s3000_s24 + $0x1c0] sm:$0xff] %vm2030_vm2, %v1958_v44  ;;  %2151 = vst.msk [vmem:[%s3000_s24 + $0x3c0] sm:$0xff] %vm2030_vm2, %v2022_v45  ;;  %v1831_v50 = vadd.f32 %v3348_v58, %v1696_v46  ;;  %v1895_v51 = vadd.f32 %v3348_v58, %v1760_v47 }
 0x1e9   : > { %v1283_v53 = vpop.f32.mrb[116].mxu0  ;;  %v1603_v54 = vpop.f32.mrb[116].mxu1 }
 0x1ea   : > { %v1959_v55 = vmax.f32 %v1831_v50, 0.0  ;;  %v2023_v56 = vmax.f32 %v1895_v51, 0.0  ;;  %v1697_v57 = vmul.f32 %v3330_v13, %v1283_v53  ;;  %v1761_v59 = vmul.f32 %v3330_v13, %v1603_v54  ;;  %v1285_v60 = vpop.f32.mrb[117].mxu0  ;;  %v1605_v61 = vpop.f32.mrb[117].mxu1 }
 0x1ec   : > { %2088 = vst.msk [vmem:[%s3000_s24 + $0x1c8] sm:$0xff] %vm2030_vm2, %v1959_v55  ;;  %2152 = vst.msk [vmem:[%s3000_s24 + $0x3c8] sm:$0xff] %vm2030_vm2, %v2023_v56  ;;  %v1832_v62 = vadd.f32 %v3348_v58, %v1697_v57  ;;  %v1896_v63 = vadd.f32 %v3348_v58, %v1761_v59 }
 0x1ed   : > { %v1288_v0 = vpop.f32.mrb[118].mxu0  ;;  %v1608_v1 = vpop.f32.mrb[118].mxu1 }
 0x1ee   : > { %v1960_v2 = vmax.f32 %v1832_v62, 0.0  ;;  %v2024_v3 = vmax.f32 %v1896_v63, 0.0  ;;  %v1698_v4 = vmul.f32 %v3330_v13, %v1288_v0  ;;  %v1762_v5 = vmul.f32 %v3330_v13, %v1608_v1  ;;  %v1290_v6 = vpop.f32.mrb[119].mxu0  ;;  %v1610_v7 = vpop.f32.mrb[119].mxu1 }
 0x1f0   : > { %2089 = vst.msk [vmem:[%s3000_s24 + $0x1d0] sm:$0xff] %vm2030_vm2, %v1960_v2  ;;  %2153 = vst.msk [vmem:[%s3000_s24 + $0x3d0] sm:$0xff] %vm2030_vm2, %v2024_v3  ;;  %v1833_v8 = vadd.f32 %v3348_v58, %v1698_v4  ;;  %v1897_v9 = vadd.f32 %v3348_v58, %v1762_v5 }
 0x1f1   : > { %v1293_v10 = vpop.f32.mrb[120].mxu0  ;;  %v1613_v11 = vpop.f32.mrb[120].mxu1 }
 0x1f2   : > { %v1961_v12 = vmax.f32 %v1833_v8, 0.0  ;;  %v2025_v14 = vmax.f32 %v1897_v9, 0.0  ;;  %v1699_v15 = vmul.f32 %v3330_v13, %v1293_v10  ;;  %v1763_v16 = vmul.f32 %v3330_v13, %v1613_v11  ;;  %v1295_v17 = vpop.f32.mrb[121].mxu0  ;;  %v1615_v18 = vpop.f32.mrb[121].mxu1 }
 0x1f4   : > { %2090 = vst.msk [vmem:[%s3000_s24 + $0x1d8] sm:$0xff] %vm2030_vm2, %v1961_v12  ;;  %2154 = vst.msk [vmem:[%s3000_s24 + $0x3d8] sm:$0xff] %vm2030_vm2, %v2025_v14  ;;  %v1834_v52 = vadd.f32 %v3348_v58, %v1699_v15  ;;  %v1898_v19 = vadd.f32 %v3348_v58, %v1763_v16 }
 0x1f5   : > { %v1298_v20 = vpop.f32.mrb[122].mxu0  ;;  %v1618_v21 = vpop.f32.mrb[122].mxu1 }
 0x1f6   : > { %v1962_v22 = vmax.f32 %v1834_v52, 0.0  ;;  %v2026_v23 = vmax.f32 %v1898_v19, 0.0  ;;  %v1700_v24 = vmul.f32 %v3330_v13, %v1298_v20  ;;  %v1764_v25 = vmul.f32 %v3330_v13, %v1618_v21  ;;  %v1300_v26 = vpop.f32.mrb[123].mxu0  ;;  %v1620_v27 = vpop.f32.mrb[123].mxu1 }
 0x1f8   : > { %2091 = vst.msk [vmem:[%s3000_s24 + $0x1e0] sm:$0xff] %vm2030_vm2, %v1962_v22  ;;  %2155 = vst.msk [vmem:[%s3000_s24 + $0x3e0] sm:$0xff] %vm2030_vm2, %v2026_v23  ;;  %v1835_v28 = vadd.f32 %v3348_v58, %v1700_v24  ;;  %v1899_v29 = vadd.f32 %v3348_v58, %v1764_v25 }
 0x1f9   : > { %v1303_v30 = vpop.f32.mrb[124].mxu0  ;;  %v1623_v31 = vpop.f32.mrb[124].mxu1 }
 0x1fa   : > { %v1963_v32 = vmax.f32 %v1835_v28, 0.0  ;;  %v2027_v33 = vmax.f32 %v1899_v29, 0.0  ;;  %v1701_v34 = vmul.f32 %v3330_v13, %v1303_v30  ;;  %v1765_v35 = vmul.f32 %v3330_v13, %v1623_v31  ;;  %v1305_v36 = vpop.f32.mrb[125].mxu0  ;;  %v1625_v37 = vpop.f32.mrb[125].mxu1 }
 0x1fc   : > { %2092 = vst.msk [vmem:[%s3000_s24 + $0x1e8] sm:$0xff] %vm2030_vm2, %v1963_v32  ;;  %2156 = vst.msk [vmem:[%s3000_s24 + $0x3e8] sm:$0xff] %vm2030_vm2, %v2027_v33  ;;  %v1836_v38 = vadd.f32 %v3348_v58, %v1701_v34  ;;  %v1900_v39 = vadd.f32 %v3348_v58, %v1765_v35 }
 0x1fd   : > { %v1308_v40 = vpop.f32.mrb[126].mxu0  ;;  %v1628_v41 = vpop.f32.mrb[126].mxu1 }
 0x1fe   : > { %v1964_v42 = vmax.f32 %v1836_v38, 0.0  ;;  %v2028_v43 = vmax.f32 %v1900_v39, 0.0  ;;  %v1702_v44 = vmul.f32 %v3330_v13, %v1308_v40  ;;  %v1766_v45 = vmul.f32 %v3330_v13, %v1628_v41  ;;  %v1310_v46 = vpop.f32.mrb[127].mxu0  ;;  %v1630_v47 = vpop.f32.mrb[127].mxu1 }
 0x200   : > { %2093 = vst.msk [vmem:[%s3000_s24 + $0x1f0] sm:$0xff] %vm2030_vm2, %v1964_v42  ;;  %2157 = vst.msk [vmem:[%s3000_s24 + $0x3f0] sm:$0xff] %vm2030_vm2, %v2028_v43  ;;  %v1837_v48 = vadd.f32 %v3348_v58, %v1702_v44  ;;  %v1901_v49 = vadd.f32 %v3348_v58, %v1766_v45 }
 0x202   : > { %v1965_v50 = vmax.f32 %v1837_v48, 0.0  ;;  %v2029_v51 = vmax.f32 %v1901_v49, 0.0 }
 0x204   : > { %2094 = vst.msk [vmem:[%s3000_s24 + $0x1f8] sm:$0xff] %vm2030_vm2, %v1965_v50  ;;  %2158 = vst.msk [vmem:[%s3000_s24 + $0x3f8] sm:$0xff] %vm2030_vm2, %v2029_v51 }
 0x205 PF: > { %s14_s17 = sadd.s32 1, %s2520_s17   ;;  %s3586_s15 = smov %s2516_s16 }
 0x206   : > { %p11_p5 = scmp.ge.s32.totalorder %s14_s17, 4   ;;  %s3587_s16 = smov %s3589_s18 }
 0x208   :  { %13 = sbr.rel (!%p11_p5) target bundleno = 2 (0x2), region = 75 }

</bundles_post_ra>
